<compile_context>
chip_gen: v7x
topology: tpu7x:2x2x1
jax: 0.10.0
libtpu: 0.0.40
codegen_flags: <defaults>
</compile_context>

<pallas_src>
import jax
import jax.numpy as jnp
from jax.experimental import pallas as pl
from jax.experimental.pallas import tpu as pltpu

LN_EPS = 1e-5


def _ln(v, g, b):
    """LayerNorm over last dim, eps=1e-5, biased variance via E[x^2]-mu^2
    (one fewer elementwise pass than the two-pass form; same math)."""
    mu = jnp.mean(v, axis=-1, keepdims=True)
    var = jnp.mean(v * v, axis=-1, keepdims=True) - mu * mu
    return (v - mu) * jax.lax.rsqrt(var + LN_EPS) * g + b


def _make_gru_kernel(chunk, B, H, bidirectional):
    """Recurrent part only.
       inputs : xp_f [, xp_b] (chunk,B,3H), wh (H,3H), bh (1,3H), gh1,bh1 (1,2H), gh2,bh2 (1,H)
       outputs: out_f [, out_b] (chunk,B,H) time-major blocks
       scratch: h (R,H), R = 2B (rows 0:B fwd, B:2B bwd) or B."""

    def kernel(*refs):
        if bidirectional:
            (xp_f_ref, xp_b_ref, wh_ref, bh_ref,
             gh1_ref, bh1_ref, gh2_ref, bh2_ref,
             out_f_ref, out_b_ref, h_ref) = refs
        else:
            (xp_f_ref, wh_ref, bh_ref,
             gh1_ref, bh1_ref, gh2_ref, bh2_ref,
             out_f_ref, h_ref) = refs
            xp_b_ref = out_b_ref = None

        # h = 0 only at the first chunk of the sequence (time is grid axis 0).
        @pl.when(pl.program_id(0) == 0)
        def _():
            h_ref[...] = jnp.zeros_like(h_ref)

        # Hoist constant reads (weights / biases / LN params) out of the time loop so the
        # (1,N) broadcasts are not re-materialized every iteration.
        wh = wh_ref[...]
        bh = bh_ref[...]
        gh1, bh1 = gh1_ref[...], bh1_ref[...]
        gh2, bh2 = gh2_ref[...], bh2_ref[...]

        for i in range(chunk):                           # static unroll over the chunk
            h = h_ref[...]                               # (R, H)
            # single fused h-projection for r,z,n of both directions: (R,H)@(H,3H)
            hp = jnp.dot(h, wh, preferred_element_type=jnp.float32) + bh
            hrz_ln = _ln(hp[:, :2 * H], gh1, bh1)        # LNh1(Whrz h)
            hn_ln = _ln(hp[:, 2 * H:], gh2, bh2)         # LNh2(Whn  h)

            if bidirectional:
                # forward consumes time t = c*chunk+i, backward consumes t = T-1-(c*chunk+i)
                xp = jnp.concatenate([xp_f_ref[i], xp_b_ref[chunk - 1 - i]], axis=0)
            else:
                xp = xp_f_ref[i]                         # already LN'd x projections

            gates = jax.nn.sigmoid(xp[:, :2 * H] + hrz_ln)
            rt, zt = gates[:, :H], gates[:, H:]
            nt = jnp.tanh(xp[:, 2 * H:] + rt * hn_ln)
            h_new = (1.0 - zt) * nt + zt * h

            h_ref[...] = h_new
            out_f_ref[i] = h_new[:B]
            if bidirectional:
                out_b_ref[chunk - 1 - i] = h_new[B:]

    return kernel


def _pick_chunk(T, max_chunk=16):
    c = min(T, max_chunk)
    while T % c:
        c -= 1
    return max(c, 1)


def _run_recurrence(xp, wh, bh, gh1, bh1, gh2, bh2, bidirectional, chunk):
    """xp: (T, B, 3H) precomputed LN'd x-projections. Returns out_f[, out_b] as (T,B,H)."""
    T, B, threeH = xp.shape
    H = threeH // 3
    assert T % chunk == 0
    nC = T // chunk

    fwd_map = lambda c: (c, 0, 0)
    bwd_map = lambda c: (nC - 1 - c, 0, 0)
    const_spec = lambda a: pl.BlockSpec(a.shape, lambda c: (0, 0))

    consts = [wh, bh, gh1, bh1, gh2, bh2]
    in_arrays = [xp] + ([xp] if bidirectional else []) + consts
    in_specs = [pl.BlockSpec((chunk, B, threeH), fwd_map)]
    if bidirectional:
        in_specs.append(pl.BlockSpec((chunk, B, threeH), bwd_map))
    in_specs += [const_spec(a) for a in consts]

    if bidirectional:
        out_shape = (jax.ShapeDtypeStruct((T, B, H), jnp.float32),
                     jax.ShapeDtypeStruct((T, B, H), jnp.float32))
        out_specs = (pl.BlockSpec((chunk, B, H), fwd_map),
                     pl.BlockSpec((chunk, B, H), bwd_map))
    else:
        out_shape = jax.ShapeDtypeStruct((T, B, H), jnp.float32)
        out_specs = pl.BlockSpec((chunk, B, H), fwd_map)

    rows = 2 * B if bidirectional else B
    kernel = _make_gru_kernel(chunk, B, H, bidirectional)

    return pl.pallas_call(
        kernel,
        out_shape=out_shape,
        grid_spec=pltpu.PrefetchScalarGridSpec(
            num_scalar_prefetch=0,
            grid=(nC,),
            in_specs=in_specs,
            out_specs=out_specs,
            scratch_shapes=[pltpu.VMEM((rows, H), jnp.float32)],
        ),
        compiler_params=pltpu.CompilerParams(
            dimension_semantics=("arbitrary",),          # serial recurrence over time chunks
            vmem_limit_bytes=32 * 1024 * 1024,
        ),
    )(*in_arrays)


def gru_forward(x, params, bidirectional=True, chunk=None):
    """x: (B, T, D) -> (output (B, T, hidden_size), None); hidden_size = 2H if bidirectional."""
    B, T, D = x.shape
    H = params["whn_t"].shape[0]
    hi = jax.lax.Precision.HIGHEST

    # Fused weights: x-side (D, 3H), h-side (H, 3H); columns [0:2H]->(r,z), [2H:3H]->n.
    wx = jnp.concatenate([params["wxrz_t"], params["wxn_t"]], axis=1)
    bx = jnp.concatenate([params["bxrz"], params["bxn"]], axis=1)
    wh = jnp.concatenate([params["whrz_t"], params["whn_t"]], axis=1)
    bh = jnp.concatenate([params["bhrz"], params["bhn"]], axis=1)

    # Hoisted input projection + x-side LayerNorms for all T steps in one batched matmul,
    # emitted time-major so no standalone activation transpose is materialized.
    proj = jnp.einsum("btd,dk->tbk", x, wx,
                      preferred_element_type=jnp.float32, precision=hi) + bx   # (T, B, 3H)
    xp = jnp.concatenate(
        [_ln(proj[..., :2 * H], params["gx1"], params["bx1"]),   # LNx1(Wxrz x)
         _ln(proj[..., 2 * H:], params["gx2"], params["bx2"])],  # LNx2(Wxn  x)
        axis=-1)

    if chunk is None:
        chunk = _pick_chunk(T)

    outs = _run_recurrence(xp, wh, bh, params["gh1"], params["bh1"],
                           params["gh2"], params["bh2"], bidirectional, chunk)
    if bidirectional:
        out_f, out_b = outs
        out = jnp.concatenate([out_f, out_b], axis=-1)            # (T, B, 2H)
    else:
        out = outs                                                # (T, B, H)
    # single copy back to batch-major (XLA fuses the transpose into the concat)
    return jnp.transpose(out, (1, 0, 2)), None


def init_params(key, input_size, hidden_size, bidirectional=True):
    """Shapes matching the module's __init__ (PyTorch-style uniform init); weights stored
    transposed as (in, out) for x @ W."""
    H = hidden_size // 2 if bidirectional else hidden_size
    D = input_size
    ks = jax.random.split(key, 4)

    def linear(k, fan_in, fan_out):
        bound = 1.0 / float(fan_in) ** 0.5
        kw, kb = jax.random.split(k)
        w_t = jax.random.uniform(kw, (fan_in, fan_out), jnp.float32, -bound, bound)
        b = jax.random.uniform(kb, (1, fan_out), jnp.float32, -bound, bound)
        return w_t, b

    wxrz_t, bxrz = linear(ks[0], D, 2 * H)
    whrz_t, bhrz = linear(ks[1], H, 2 * H)
    wxn_t, bxn = linear(ks[2], D, H)
    whn_t, bhn = linear(ks[3], H, H)

    return dict(
        wxrz_t=wxrz_t, bxrz=bxrz, whrz_t=whrz_t, bhrz=bhrz,
        wxn_t=wxn_t, bxn=bxn, whn_t=whn_t, bhn=bhn,
        # LayerNorm params: PyTorch default weight=1, bias=0
        gx1=jnp.ones((1, 2 * H), jnp.float32), bx1=jnp.zeros((1, 2 * H), jnp.float32),
        gh1=jnp.ones((1, 2 * H), jnp.float32), bh1=jnp.zeros((1, 2 * H), jnp.float32),
        gx2=jnp.ones((1, H), jnp.float32), bx2=jnp.zeros((1, H), jnp.float32),
        gh2=jnp.ones((1, H), jnp.float32), bh2=jnp.zeros((1, H), jnp.float32),
    )


def _ln_ref(v, g, b):
    mu = jnp.mean(v, axis=-1, keepdims=True)
    var = jnp.mean((v - mu) ** 2, axis=-1, keepdims=True)
    return (v - mu) * jax.lax.rsqrt(var + LN_EPS) * g + b


def gru_reference(x, params, bidirectional=True):
    """Pure-JAX reference (lax.scan) mirroring the PyTorch forward for validation."""
    p = params
    H = p["whn_t"].shape[0]
    hi = jax.lax.Precision.HIGHEST

    def step(h, xt):
        xrz = jnp.dot(xt, p["wxrz_t"], precision=hi) + p["bxrz"]
        hrz = jnp.dot(h, p["whrz_t"], precision=hi) + p["bhrz"]
        gates = jax.nn.sigmoid(_ln_ref(xrz, p["gx1"], p["bx1"]) +
                               _ln_ref(hrz, p["gh1"], p["bh1"]))
        rt, zt = gates[:, :H], gates[:, H:]
        xn = jnp.dot(xt, p["wxn_t"], precision=hi) + p["bxn"]
        hn = jnp.dot(h, p["whn_t"], precision=hi) + p["bhn"]
        nt = jnp.tanh(_ln_ref(xn, p["gx2"], p["bx2"]) + rt * _ln_ref(hn, p["gh2"], p["bh2"]))
        ht = (1.0 - zt) * nt + zt * h
        return ht, ht

    x_t = jnp.transpose(x, (1, 0, 2))
    h0 = jnp.zeros((x.shape[0], H), jnp.float32)
    _, out_f = jax.lax.scan(step, h0, x_t)
    out = out_f
    if bidirectional:
        _, out_b = jax.lax.scan(step, h0, x_t[::-1])
        out = jnp.concatenate([out_f, out_b[::-1]], axis=-1)
    return jnp.transpose(out, (1, 0, 2))


if __name__ == "__main__":
    B, T, INPUT_SIZE, HIDDEN_SIZE = 2, 8, 16, 32   # bidirectional -> internal H = 16
    key = jax.random.PRNGKey(0)
    kx, kp = jax.random.split(key)

    x = jax.random.normal(kx, (B, T, INPUT_SIZE), jnp.float32)
    params = init_params(kp, INPUT_SIZE, HIDDEN_SIZE, bidirectional=True)

    out, _ = gru_forward(x, params, bidirectional=True)
    out = jax.block_until_ready(out)

    ref = jax.block_until_ready(gru_reference(x, params, bidirectional=True))
    assert out.shape == (B, T, HIDDEN_SIZE), out.shape
    assert jnp.allclose(out, ref, atol=1e-5, rtol=1e-5), float(jnp.max(jnp.abs(out - ref)))

    print("KERNEL_OK")
</pallas_src>

<mosaic_0001>
module attributes {stable_mosaic.version = 11 : i64} {
  func.func @kernel(%arg0: i32, %arg1: memref<8x2x48xf32, #tpu.memory_space<vmem>>, %arg2: memref<8x2x48xf32, #tpu.memory_space<vmem>>, %arg3: memref<16x48xf32, #tpu.memory_space<vmem>>, %arg4: memref<1x48xf32, #tpu.memory_space<vmem>>, %arg5: memref<1x32xf32, #tpu.memory_space<vmem>>, %arg6: memref<1x32xf32, #tpu.memory_space<vmem>>, %arg7: memref<1x16xf32, #tpu.memory_space<vmem>>, %arg8: memref<1x16xf32, #tpu.memory_space<vmem>>, %arg9: memref<8x2x16xf32, #tpu.memory_space<vmem>>, %arg10: memref<8x2x16xf32, #tpu.memory_space<vmem>>, %arg11: memref<4x16xf32, #tpu.memory_space<vmem>>) attributes {dimension_semantics = [#tpu.dimension_semantics<arbitrary>], iteration_bounds = array<i64: 1>, scalar_prefetch = 0 : i64, scratch_operands = 1 : i64, tpu.core_type = #tpu.core_type<tc>, window_params = [{transform_indices = @transform_0, window_bounds = array<i64: 8, 2, 48>}, {transform_indices = @transform_1, window_bounds = array<i64: 8, 2, 48>}, {pipeline_mode = #tpu.pipeline_mode<synchronous>, transform_indices = @transform_2, window_bounds = array<i64: 16, 48>}, {pipeline_mode = #tpu.pipeline_mode<synchronous>, transform_indices = @transform_3, window_bounds = array<i64: 1, 48>}, {pipeline_mode = #tpu.pipeline_mode<synchronous>, transform_indices = @transform_4, window_bounds = array<i64: 1, 32>}, {pipeline_mode = #tpu.pipeline_mode<synchronous>, transform_indices = @transform_5, window_bounds = array<i64: 1, 32>}, {pipeline_mode = #tpu.pipeline_mode<synchronous>, transform_indices = @transform_6, window_bounds = array<i64: 1, 16>}, {pipeline_mode = #tpu.pipeline_mode<synchronous>, transform_indices = @transform_7, window_bounds = array<i64: 1, 16>}, {transform_indices = @transform_8, window_bounds = array<i64: 8, 2, 16>}, {transform_indices = @transform_9, window_bounds = array<i64: 8, 2, 16>}]} {
    %c0_i32 = arith.constant 0 : i32
    %0 = arith.cmpi eq, %arg0, %c0_i32 : i32
    %1 = arith.extui %0 : i1 to i32
    %c0_i32_0 = arith.constant 0 : i32
    %2 = arith.cmpi ne, %1, %c0_i32_0 : i32
    scf.if %2 {
      %cst_236 = arith.constant 0.000000e+00 : f32
      %665 = vector.broadcast %cst_236 : f32 to vector<4x16xf32>
      %c0_237 = arith.constant 0 : index
      %c0_238 = arith.constant 0 : index
      %666 = vector.load %arg11[%c0_237, %c0_238] : memref<4x16xf32, #tpu.memory_space<vmem>>, vector<4x16xf32>
      tpu.vector_store %arg11[%c0_237, %c0_238], %665 {strides = array<i32>} : memref<4x16xf32, #tpu.memory_space<vmem>>, vector<4x16xf32>,
    } else {
    }
    %c0 = arith.constant 0 : index
    %c0_1 = arith.constant 0 : index
    %3 = vector.load %arg3[%c0, %c0_1] : memref<16x48xf32, #tpu.memory_space<vmem>>, vector<16x48xf32>
    %c0_2 = arith.constant 0 : index
    %c0_3 = arith.constant 0 : index
    %4 = vector.load %arg4[%c0_2, %c0_3] : memref<1x48xf32, #tpu.memory_space<vmem>>, vector<1x48xf32>
    %c0_4 = arith.constant 0 : index
    %c0_5 = arith.constant 0 : index
    %5 = vector.load %arg5[%c0_4, %c0_5] : memref<1x32xf32, #tpu.memory_space<vmem>>, vector<1x32xf32>
    %c0_6 = arith.constant 0 : index
    %c0_7 = arith.constant 0 : index
    %6 = vector.load %arg6[%c0_6, %c0_7] : memref<1x32xf32, #tpu.memory_space<vmem>>, vector<1x32xf32>
    %c0_8 = arith.constant 0 : index
    %c0_9 = arith.constant 0 : index
    %7 = vector.load %arg7[%c0_8, %c0_9] : memref<1x16xf32, #tpu.memory_space<vmem>>, vector<1x16xf32>
    %c0_10 = arith.constant 0 : index
    %c0_11 = arith.constant 0 : index
    %8 = vector.load %arg8[%c0_10, %c0_11] : memref<1x16xf32, #tpu.memory_space<vmem>>, vector<1x16xf32>
    %c0_12 = arith.constant 0 : index
    %c0_13 = arith.constant 0 : index
    %9 = vector.load %arg11[%c0_12, %c0_13] : memref<4x16xf32, #tpu.memory_space<vmem>>, vector<4x16xf32>
    %cst = arith.constant dense<0.000000e+00> : vector<4x48xf32>
    %10 = tpu.matmul %9, %3, %cst {dimension_numbers = #tpu.dot_dimension_numbers<[1], [0], [0], [1], [0, 0, 1, 1], [], []>} : vector<4x16xf32>, vector<16x48xf32>, vector<4x48xf32> -> vector<4x48xf32>
    %11 = vector.broadcast %4 : vector<1x48xf32> to vector<4x48xf32>
    %12 = arith.addf %10, %11 : vector<4x48xf32>
    %13 = vector.extract_strided_slice %12 {offsets = [0, 0], sizes = [4, 32], strides = [1, 1]} : vector<4x48xf32> to vector<4x32xf32>
    %cst_14 = arith.constant dense<0.000000e+00> : vector<4xf32>
    %14 = vector.multi_reduction <add>, %13, %cst_14 [1] : vector<4x32xf32> to vector<4xf32>
    %15 = vector.shape_cast %14 : vector<4xf32> to vector<4x1xf32>
    %cst_15 = arith.constant 3.200000e+01 : f32
    %16 = vector.broadcast %cst_15 : f32 to vector<4x1xf32>
    %17 = arith.divf %15, %16 : vector<4x1xf32>
    %18 = arith.mulf %13, %13 : vector<4x32xf32>
    %cst_16 = arith.constant dense<0.000000e+00> : vector<4xf32>
    %19 = vector.multi_reduction <add>, %18, %cst_16 [1] : vector<4x32xf32> to vector<4xf32>
    %20 = vector.shape_cast %19 : vector<4xf32> to vector<4x1xf32>
    %cst_17 = arith.constant 3.200000e+01 : f32
    %21 = vector.broadcast %cst_17 : f32 to vector<4x1xf32>
    %22 = arith.divf %20, %21 : vector<4x1xf32>
    %23 = arith.mulf %17, %17 : vector<4x1xf32>
    %24 = arith.subf %22, %23 : vector<4x1xf32>
    %25 = vector.broadcast %17 : vector<4x1xf32> to vector<4x32xf32>
    %26 = arith.subf %13, %25 : vector<4x32xf32>
    %cst_18 = arith.constant 9.99999974E-6 : f32
    %27 = vector.broadcast %cst_18 : f32 to vector<4x1xf32>
    %28 = arith.addf %24, %27 : vector<4x1xf32>
    %29 = math.rsqrt %28 : vector<4x1xf32>
    %30 = vector.broadcast %29 : vector<4x1xf32> to vector<4x32xf32>
    %31 = arith.mulf %26, %30 : vector<4x32xf32>
    %32 = vector.broadcast %5 : vector<1x32xf32> to vector<4x32xf32>
    %33 = arith.mulf %31, %32 : vector<4x32xf32>
    %34 = vector.broadcast %6 : vector<1x32xf32> to vector<4x32xf32>
    %35 = arith.addf %33, %34 : vector<4x32xf32>
    %36 = vector.extract_strided_slice %12 {offsets = [0, 32], sizes = [4, 16], strides = [1, 1]} : vector<4x48xf32> to vector<4x16xf32>
    %cst_19 = arith.constant dense<0.000000e+00> : vector<4xf32>
    %37 = vector.multi_reduction <add>, %36, %cst_19 [1] : vector<4x16xf32> to vector<4xf32>
    %38 = vector.shape_cast %37 : vector<4xf32> to vector<4x1xf32>
    %cst_20 = arith.constant 1.600000e+01 : f32
    %39 = vector.broadcast %cst_20 : f32 to vector<4x1xf32>
    %40 = arith.divf %38, %39 : vector<4x1xf32>
    %41 = arith.mulf %36, %36 : vector<4x16xf32>
    %cst_21 = arith.constant dense<0.000000e+00> : vector<4xf32>
    %42 = vector.multi_reduction <add>, %41, %cst_21 [1] : vector<4x16xf32> to vector<4xf32>
    %43 = vector.shape_cast %42 : vector<4xf32> to vector<4x1xf32>
    %cst_22 = arith.constant 1.600000e+01 : f32
    %44 = vector.broadcast %cst_22 : f32 to vector<4x1xf32>
    %45 = arith.divf %43, %44 : vector<4x1xf32>
    %46 = arith.mulf %40, %40 : vector<4x1xf32>
    %47 = arith.subf %45, %46 : vector<4x1xf32>
    %48 = vector.broadcast %40 : vector<4x1xf32> to vector<4x16xf32>
    %49 = arith.subf %36, %48 : vector<4x16xf32>
    %cst_23 = arith.constant 9.99999974E-6 : f32
    %50 = vector.broadcast %cst_23 : f32 to vector<4x1xf32>
    %51 = arith.addf %47, %50 : vector<4x1xf32>
    %52 = math.rsqrt %51 : vector<4x1xf32>
    %53 = vector.broadcast %52 : vector<4x1xf32> to vector<4x16xf32>
    %54 = arith.mulf %49, %53 : vector<4x16xf32>
    %55 = vector.broadcast %7 : vector<1x16xf32> to vector<4x16xf32>
    %56 = arith.mulf %54, %55 : vector<4x16xf32>
    %57 = vector.broadcast %8 : vector<1x16xf32> to vector<4x16xf32>
    %58 = arith.addf %56, %57 : vector<4x16xf32>
    %c0_24 = arith.constant 0 : index
    %c0_25 = arith.constant 0 : index
    %c0_26 = arith.constant 0 : index
    %59 = vector.load %arg1[%c0_24, %c0_25, %c0_26] : memref<8x2x48xf32, #tpu.memory_space<vmem>>, vector<1x2x48xf32>
    %60 = vector.shape_cast %59 : vector<1x2x48xf32> to vector<2x48xf32>
    %c7 = arith.constant 7 : index
    %c0_27 = arith.constant 0 : index
    %c0_28 = arith.constant 0 : index
    %61 = vector.load %arg2[%c7, %c0_27, %c0_28] : memref<8x2x48xf32, #tpu.memory_space<vmem>>, vector<1x2x48xf32>
    %62 = vector.shape_cast %61 : vector<1x2x48xf32> to vector<2x48xf32>
    %63 = tpu.concatenate %60, %62 in 0 : vector<2x48xf32>, vector<2x48xf32> -> vector<4x48xf32>
    %64 = vector.extract_strided_slice %63 {offsets = [0, 0], sizes = [4, 32], strides = [1, 1]} : vector<4x48xf32> to vector<4x32xf32>
    %65 = arith.addf %64, %35 : vector<4x32xf32>
    %66 = arith.negf %65 : vector<4x32xf32>
    %67 = math.exp %66 : vector<4x32xf32>
    %cst_29 = arith.constant 1.000000e+00 : f32
    %68 = vector.broadcast %cst_29 : f32 to vector<4x32xf32>
    %69 = arith.addf %68, %67 : vector<4x32xf32>
    %70 = arith.divf %68, %69 : vector<4x32xf32>
    %71 = vector.extract_strided_slice %70 {offsets = [0, 0], sizes = [4, 16], strides = [1, 1]} : vector<4x32xf32> to vector<4x16xf32>
    %72 = vector.extract_strided_slice %70 {offsets = [0, 16], sizes = [4, 16], strides = [1, 1]} : vector<4x32xf32> to vector<4x16xf32>
    %73 = vector.extract_strided_slice %63 {offsets = [0, 32], sizes = [4, 16], strides = [1, 1]} : vector<4x48xf32> to vector<4x16xf32>
    %74 = arith.mulf %71, %58 : vector<4x16xf32>
    %75 = arith.addf %73, %74 : vector<4x16xf32>
    %76 = math.tanh %75 : vector<4x16xf32>
    %cst_30 = arith.constant 1.000000e+00 : f32
    %77 = vector.broadcast %cst_30 : f32 to vector<4x16xf32>
    %78 = arith.subf %77, %72 : vector<4x16xf32>
    %79 = arith.mulf %78, %76 : vector<4x16xf32>
    %80 = arith.mulf %72, %9 : vector<4x16xf32>
    %81 = arith.addf %79, %80 : vector<4x16xf32>
    %c0_31 = arith.constant 0 : index
    %c0_32 = arith.constant 0 : index
    %82 = vector.load %arg11[%c0_31, %c0_32] : memref<4x16xf32, #tpu.memory_space<vmem>>, vector<4x16xf32>
    tpu.vector_store %arg11[%c0_31, %c0_32], %81 {strides = array<i32>} : memref<4x16xf32, #tpu.memory_space<vmem>>, vector<4x16xf32>,
    %83 = vector.extract_strided_slice %81 {offsets = [0, 0], sizes = [2, 16], strides = [1, 1]} : vector<4x16xf32> to vector<2x16xf32>
    %c0_33 = arith.constant 0 : index
    %c0_34 = arith.constant 0 : index
    %c0_35 = arith.constant 0 : index
    %84 = vector.load %arg9[%c0_33, %c0_34, %c0_35] : memref<8x2x16xf32, #tpu.memory_space<vmem>>, vector<1x2x16xf32>
    %85 = vector.shape_cast %84 : vector<1x2x16xf32> to vector<2x16xf32>
    %86 = vector.shape_cast %83 : vector<2x16xf32> to vector<1x2x16xf32>
    tpu.vector_store %arg9[%c0_33, %c0_34, %c0_35], %86 {strides = array<i32>} : memref<8x2x16xf32, #tpu.memory_space<vmem>>, vector<1x2x16xf32>,
    %87 = vector.extract_strided_slice %81 {offsets = [2, 0], sizes = [2, 16], strides = [1, 1]} : vector<4x16xf32> to vector<2x16xf32>
    %c7_36 = arith.constant 7 : index
    %c0_37 = arith.constant 0 : index
    %c0_38 = arith.constant 0 : index
    %88 = vector.load %arg10[%c7_36, %c0_37, %c0_38] : memref<8x2x16xf32, #tpu.memory_space<vmem>>, vector<1x2x16xf32>
    %89 = vector.shape_cast %88 : vector<1x2x16xf32> to vector<2x16xf32>
    %90 = vector.shape_cast %87 : vector<2x16xf32> to vector<1x2x16xf32>
    tpu.vector_store %arg10[%c7_36, %c0_37, %c0_38], %90 {strides = array<i32>} : memref<8x2x16xf32, #tpu.memory_space<vmem>>, vector<1x2x16xf32>,
    %c0_39 = arith.constant 0 : index
    %c0_40 = arith.constant 0 : index
    %91 = vector.load %arg11[%c0_39, %c0_40] : memref<4x16xf32, #tpu.memory_space<vmem>>, vector<4x16xf32>
    %cst_41 = arith.constant dense<0.000000e+00> : vector<4x48xf32>
    %92 = tpu.matmul %91, %3, %cst_41 {dimension_numbers = #tpu.dot_dimension_numbers<[1], [0], [0], [1], [0, 0, 1, 1], [], []>} : vector<4x16xf32>, vector<16x48xf32>, vector<4x48xf32> -> vector<4x48xf32>
    %93 = vector.broadcast %4 : vector<1x48xf32> to vector<4x48xf32>
    %94 = arith.addf %92, %93 : vector<4x48xf32>
    %95 = vector.extract_strided_slice %94 {offsets = [0, 0], sizes = [4, 32], strides = [1, 1]} : vector<4x48xf32> to vector<4x32xf32>
    %cst_42 = arith.constant dense<0.000000e+00> : vector<4xf32>
    %96 = vector.multi_reduction <add>, %95, %cst_42 [1] : vector<4x32xf32> to vector<4xf32>
    %97 = vector.shape_cast %96 : vector<4xf32> to vector<4x1xf32>
    %cst_43 = arith.constant 3.200000e+01 : f32
    %98 = vector.broadcast %cst_43 : f32 to vector<4x1xf32>
    %99 = arith.divf %97, %98 : vector<4x1xf32>
    %100 = arith.mulf %95, %95 : vector<4x32xf32>
    %cst_44 = arith.constant dense<0.000000e+00> : vector<4xf32>
    %101 = vector.multi_reduction <add>, %100, %cst_44 [1] : vector<4x32xf32> to vector<4xf32>
    %102 = vector.shape_cast %101 : vector<4xf32> to vector<4x1xf32>
    %cst_45 = arith.constant 3.200000e+01 : f32
    %103 = vector.broadcast %cst_45 : f32 to vector<4x1xf32>
    %104 = arith.divf %102, %103 : vector<4x1xf32>
    %105 = arith.mulf %99, %99 : vector<4x1xf32>
    %106 = arith.subf %104, %105 : vector<4x1xf32>
    %107 = vector.broadcast %99 : vector<4x1xf32> to vector<4x32xf32>
    %108 = arith.subf %95, %107 : vector<4x32xf32>
    %cst_46 = arith.constant 9.99999974E-6 : f32
    %109 = vector.broadcast %cst_46 : f32 to vector<4x1xf32>
    %110 = arith.addf %106, %109 : vector<4x1xf32>
    %111 = math.rsqrt %110 : vector<4x1xf32>
    %112 = vector.broadcast %111 : vector<4x1xf32> to vector<4x32xf32>
    %113 = arith.mulf %108, %112 : vector<4x32xf32>
    %114 = vector.broadcast %5 : vector<1x32xf32> to vector<4x32xf32>
    %115 = arith.mulf %113, %114 : vector<4x32xf32>
    %116 = vector.broadcast %6 : vector<1x32xf32> to vector<4x32xf32>
    %117 = arith.addf %115, %116 : vector<4x32xf32>
    %118 = vector.extract_strided_slice %94 {offsets = [0, 32], sizes = [4, 16], strides = [1, 1]} : vector<4x48xf32> to vector<4x16xf32>
    %cst_47 = arith.constant dense<0.000000e+00> : vector<4xf32>
    %119 = vector.multi_reduction <add>, %118, %cst_47 [1] : vector<4x16xf32> to vector<4xf32>
    %120 = vector.shape_cast %119 : vector<4xf32> to vector<4x1xf32>
    %cst_48 = arith.constant 1.600000e+01 : f32
    %121 = vector.broadcast %cst_48 : f32 to vector<4x1xf32>
    %122 = arith.divf %120, %121 : vector<4x1xf32>
    %123 = arith.mulf %118, %118 : vector<4x16xf32>
    %cst_49 = arith.constant dense<0.000000e+00> : vector<4xf32>
    %124 = vector.multi_reduction <add>, %123, %cst_49 [1] : vector<4x16xf32> to vector<4xf32>
    %125 = vector.shape_cast %124 : vector<4xf32> to vector<4x1xf32>
    %cst_50 = arith.constant 1.600000e+01 : f32
    %126 = vector.broadcast %cst_50 : f32 to vector<4x1xf32>
    %127 = arith.divf %125, %126 : vector<4x1xf32>
    %128 = arith.mulf %122, %122 : vector<4x1xf32>
    %129 = arith.subf %127, %128 : vector<4x1xf32>
    %130 = vector.broadcast %122 : vector<4x1xf32> to vector<4x16xf32>
    %131 = arith.subf %118, %130 : vector<4x16xf32>
    %cst_51 = arith.constant 9.99999974E-6 : f32
    %132 = vector.broadcast %cst_51 : f32 to vector<4x1xf32>
    %133 = arith.addf %129, %132 : vector<4x1xf32>
    %134 = math.rsqrt %133 : vector<4x1xf32>
    %135 = vector.broadcast %134 : vector<4x1xf32> to vector<4x16xf32>
    %136 = arith.mulf %131, %135 : vector<4x16xf32>
    %137 = vector.broadcast %7 : vector<1x16xf32> to vector<4x16xf32>
    %138 = arith.mulf %136, %137 : vector<4x16xf32>
    %139 = vector.broadcast %8 : vector<1x16xf32> to vector<4x16xf32>
    %140 = arith.addf %138, %139 : vector<4x16xf32>
    %c1 = arith.constant 1 : index
    %c0_52 = arith.constant 0 : index
    %c0_53 = arith.constant 0 : index
    %141 = vector.load %arg1[%c1, %c0_52, %c0_53] : memref<8x2x48xf32, #tpu.memory_space<vmem>>, vector<1x2x48xf32>
    %142 = vector.shape_cast %141 : vector<1x2x48xf32> to vector<2x48xf32>
    %c6 = arith.constant 6 : index
    %c0_54 = arith.constant 0 : index
    %c0_55 = arith.constant 0 : index
    %143 = vector.load %arg2[%c6, %c0_54, %c0_55] : memref<8x2x48xf32, #tpu.memory_space<vmem>>, vector<1x2x48xf32>
    %144 = vector.shape_cast %143 : vector<1x2x48xf32> to vector<2x48xf32>
    %145 = tpu.concatenate %142, %144 in 0 : vector<2x48xf32>, vector<2x48xf32> -> vector<4x48xf32>
    %146 = vector.extract_strided_slice %145 {offsets = [0, 0], sizes = [4, 32], strides = [1, 1]} : vector<4x48xf32> to vector<4x32xf32>
    %147 = arith.addf %146, %117 : vector<4x32xf32>
    %148 = arith.negf %147 : vector<4x32xf32>
    %149 = math.exp %148 : vector<4x32xf32>
    %cst_56 = arith.constant 1.000000e+00 : f32
    %150 = vector.broadcast %cst_56 : f32 to vector<4x32xf32>
    %151 = arith.addf %150, %149 : vector<4x32xf32>
    %152 = arith.divf %150, %151 : vector<4x32xf32>
    %153 = vector.extract_strided_slice %152 {offsets = [0, 0], sizes = [4, 16], strides = [1, 1]} : vector<4x32xf32> to vector<4x16xf32>
    %154 = vector.extract_strided_slice %152 {offsets = [0, 16], sizes = [4, 16], strides = [1, 1]} : vector<4x32xf32> to vector<4x16xf32>
    %155 = vector.extract_strided_slice %145 {offsets = [0, 32], sizes = [4, 16], strides = [1, 1]} : vector<4x48xf32> to vector<4x16xf32>
    %156 = arith.mulf %153, %140 : vector<4x16xf32>
    %157 = arith.addf %155, %156 : vector<4x16xf32>
    %158 = math.tanh %157 : vector<4x16xf32>
    %cst_57 = arith.constant 1.000000e+00 : f32
    %159 = vector.broadcast %cst_57 : f32 to vector<4x16xf32>
    %160 = arith.subf %159, %154 : vector<4x16xf32>
    %161 = arith.mulf %160, %158 : vector<4x16xf32>
    %162 = arith.mulf %154, %91 : vector<4x16xf32>
    %163 = arith.addf %161, %162 : vector<4x16xf32>
    %c0_58 = arith.constant 0 : index
    %c0_59 = arith.constant 0 : index
    %164 = vector.load %arg11[%c0_58, %c0_59] : memref<4x16xf32, #tpu.memory_space<vmem>>, vector<4x16xf32>
    tpu.vector_store %arg11[%c0_58, %c0_59], %163 {strides = array<i32>} : memref<4x16xf32, #tpu.memory_space<vmem>>, vector<4x16xf32>,
    %165 = vector.extract_strided_slice %163 {offsets = [0, 0], sizes = [2, 16], strides = [1, 1]} : vector<4x16xf32> to vector<2x16xf32>
    %c1_60 = arith.constant 1 : index
    %c0_61 = arith.constant 0 : index
    %c0_62 = arith.constant 0 : index
    %166 = vector.load %arg9[%c1_60, %c0_61, %c0_62] : memref<8x2x16xf32, #tpu.memory_space<vmem>>, vector<1x2x16xf32>
    %167 = vector.shape_cast %166 : vector<1x2x16xf32> to vector<2x16xf32>
    %168 = vector.shape_cast %165 : vector<2x16xf32> to vector<1x2x16xf32>
    tpu.vector_store %arg9[%c1_60, %c0_61, %c0_62], %168 {strides = array<i32>} : memref<8x2x16xf32, #tpu.memory_space<vmem>>, vector<1x2x16xf32>,
    %169 = vector.extract_strided_slice %163 {offsets = [2, 0], sizes = [2, 16], strides = [1, 1]} : vector<4x16xf32> to vector<2x16xf32>
    %c6_63 = arith.constant 6 : index
    %c0_64 = arith.constant 0 : index
    %c0_65 = arith.constant 0 : index
    %170 = vector.load %arg10[%c6_63, %c0_64, %c0_65] : memref<8x2x16xf32, #tpu.memory_space<vmem>>, vector<1x2x16xf32>
    %171 = vector.shape_cast %170 : vector<1x2x16xf32> to vector<2x16xf32>
    %172 = vector.shape_cast %169 : vector<2x16xf32> to vector<1x2x16xf32>
    tpu.vector_store %arg10[%c6_63, %c0_64, %c0_65], %172 {strides = array<i32>} : memref<8x2x16xf32, #tpu.memory_space<vmem>>, vector<1x2x16xf32>,
    %c0_66 = arith.constant 0 : index
    %c0_67 = arith.constant 0 : index
    %173 = vector.load %arg11[%c0_66, %c0_67] : memref<4x16xf32, #tpu.memory_space<vmem>>, vector<4x16xf32>
    %cst_68 = arith.constant dense<0.000000e+00> : vector<4x48xf32>
    %174 = tpu.matmul %173, %3, %cst_68 {dimension_numbers = #tpu.dot_dimension_numbers<[1], [0], [0], [1], [0, 0, 1, 1], [], []>} : vector<4x16xf32>, vector<16x48xf32>, vector<4x48xf32> -> vector<4x48xf32>
    %175 = vector.broadcast %4 : vector<1x48xf32> to vector<4x48xf32>
    %176 = arith.addf %174, %175 : vector<4x48xf32>
    %177 = vector.extract_strided_slice %176 {offsets = [0, 0], sizes = [4, 32], strides = [1, 1]} : vector<4x48xf32> to vector<4x32xf32>
    %cst_69 = arith.constant dense<0.000000e+00> : vector<4xf32>
    %178 = vector.multi_reduction <add>, %177, %cst_69 [1] : vector<4x32xf32> to vector<4xf32>
    %179 = vector.shape_cast %178 : vector<4xf32> to vector<4x1xf32>
    %cst_70 = arith.constant 3.200000e+01 : f32
    %180 = vector.broadcast %cst_70 : f32 to vector<4x1xf32>
    %181 = arith.divf %179, %180 : vector<4x1xf32>
    %182 = arith.mulf %177, %177 : vector<4x32xf32>
    %cst_71 = arith.constant dense<0.000000e+00> : vector<4xf32>
    %183 = vector.multi_reduction <add>, %182, %cst_71 [1] : vector<4x32xf32> to vector<4xf32>
    %184 = vector.shape_cast %183 : vector<4xf32> to vector<4x1xf32>
    %cst_72 = arith.constant 3.200000e+01 : f32
    %185 = vector.broadcast %cst_72 : f32 to vector<4x1xf32>
    %186 = arith.divf %184, %185 : vector<4x1xf32>
    %187 = arith.mulf %181, %181 : vector<4x1xf32>
    %188 = arith.subf %186, %187 : vector<4x1xf32>
    %189 = vector.broadcast %181 : vector<4x1xf32> to vector<4x32xf32>
    %190 = arith.subf %177, %189 : vector<4x32xf32>
    %cst_73 = arith.constant 9.99999974E-6 : f32
    %191 = vector.broadcast %cst_73 : f32 to vector<4x1xf32>
    %192 = arith.addf %188, %191 : vector<4x1xf32>
    %193 = math.rsqrt %192 : vector<4x1xf32>
    %194 = vector.broadcast %193 : vector<4x1xf32> to vector<4x32xf32>
    %195 = arith.mulf %190, %194 : vector<4x32xf32>
    %196 = vector.broadcast %5 : vector<1x32xf32> to vector<4x32xf32>
    %197 = arith.mulf %195, %196 : vector<4x32xf32>
    %198 = vector.broadcast %6 : vector<1x32xf32> to vector<4x32xf32>
    %199 = arith.addf %197, %198 : vector<4x32xf32>
    %200 = vector.extract_strided_slice %176 {offsets = [0, 32], sizes = [4, 16], strides = [1, 1]} : vector<4x48xf32> to vector<4x16xf32>
    %cst_74 = arith.constant dense<0.000000e+00> : vector<4xf32>
    %201 = vector.multi_reduction <add>, %200, %cst_74 [1] : vector<4x16xf32> to vector<4xf32>
    %202 = vector.shape_cast %201 : vector<4xf32> to vector<4x1xf32>
    %cst_75 = arith.constant 1.600000e+01 : f32
    %203 = vector.broadcast %cst_75 : f32 to vector<4x1xf32>
    %204 = arith.divf %202, %203 : vector<4x1xf32>
    %205 = arith.mulf %200, %200 : vector<4x16xf32>
    %cst_76 = arith.constant dense<0.000000e+00> : vector<4xf32>
    %206 = vector.multi_reduction <add>, %205, %cst_76 [1] : vector<4x16xf32> to vector<4xf32>
    %207 = vector.shape_cast %206 : vector<4xf32> to vector<4x1xf32>
    %cst_77 = arith.constant 1.600000e+01 : f32
    %208 = vector.broadcast %cst_77 : f32 to vector<4x1xf32>
    %209 = arith.divf %207, %208 : vector<4x1xf32>
    %210 = arith.mulf %204, %204 : vector<4x1xf32>
    %211 = arith.subf %209, %210 : vector<4x1xf32>
    %212 = vector.broadcast %204 : vector<4x1xf32> to vector<4x16xf32>
    %213 = arith.subf %200, %212 : vector<4x16xf32>
    %cst_78 = arith.constant 9.99999974E-6 : f32
    %214 = vector.broadcast %cst_78 : f32 to vector<4x1xf32>
    %215 = arith.addf %211, %214 : vector<4x1xf32>
    %216 = math.rsqrt %215 : vector<4x1xf32>
    %217 = vector.broadcast %216 : vector<4x1xf32> to vector<4x16xf32>
    %218 = arith.mulf %213, %217 : vector<4x16xf32>
    %219 = vector.broadcast %7 : vector<1x16xf32> to vector<4x16xf32>
    %220 = arith.mulf %218, %219 : vector<4x16xf32>
    %221 = vector.broadcast %8 : vector<1x16xf32> to vector<4x16xf32>
    %222 = arith.addf %220, %221 : vector<4x16xf32>
    %c2 = arith.constant 2 : index
    %c0_79 = arith.constant 0 : index
    %c0_80 = arith.constant 0 : index
    %223 = vector.load %arg1[%c2, %c0_79, %c0_80] : memref<8x2x48xf32, #tpu.memory_space<vmem>>, vector<1x2x48xf32>
    %224 = vector.shape_cast %223 : vector<1x2x48xf32> to vector<2x48xf32>
    %c5 = arith.constant 5 : index
    %c0_81 = arith.constant 0 : index
    %c0_82 = arith.constant 0 : index
    %225 = vector.load %arg2[%c5, %c0_81, %c0_82] : memref<8x2x48xf32, #tpu.memory_space<vmem>>, vector<1x2x48xf32>
    %226 = vector.shape_cast %225 : vector<1x2x48xf32> to vector<2x48xf32>
    %227 = tpu.concatenate %224, %226 in 0 : vector<2x48xf32>, vector<2x48xf32> -> vector<4x48xf32>
    %228 = vector.extract_strided_slice %227 {offsets = [0, 0], sizes = [4, 32], strides = [1, 1]} : vector<4x48xf32> to vector<4x32xf32>
    %229 = arith.addf %228, %199 : vector<4x32xf32>
    %230 = arith.negf %229 : vector<4x32xf32>
    %231 = math.exp %230 : vector<4x32xf32>
    %cst_83 = arith.constant 1.000000e+00 : f32
    %232 = vector.broadcast %cst_83 : f32 to vector<4x32xf32>
    %233 = arith.addf %232, %231 : vector<4x32xf32>
    %234 = arith.divf %232, %233 : vector<4x32xf32>
    %235 = vector.extract_strided_slice %234 {offsets = [0, 0], sizes = [4, 16], strides = [1, 1]} : vector<4x32xf32> to vector<4x16xf32>
    %236 = vector.extract_strided_slice %234 {offsets = [0, 16], sizes = [4, 16], strides = [1, 1]} : vector<4x32xf32> to vector<4x16xf32>
    %237 = vector.extract_strided_slice %227 {offsets = [0, 32], sizes = [4, 16], strides = [1, 1]} : vector<4x48xf32> to vector<4x16xf32>
    %238 = arith.mulf %235, %222 : vector<4x16xf32>
    %239 = arith.addf %237, %238 : vector<4x16xf32>
    %240 = math.tanh %239 : vector<4x16xf32>
    %cst_84 = arith.constant 1.000000e+00 : f32
    %241 = vector.broadcast %cst_84 : f32 to vector<4x16xf32>
    %242 = arith.subf %241, %236 : vector<4x16xf32>
    %243 = arith.mulf %242, %240 : vector<4x16xf32>
    %244 = arith.mulf %236, %173 : vector<4x16xf32>
    %245 = arith.addf %243, %244 : vector<4x16xf32>
    %c0_85 = arith.constant 0 : index
    %c0_86 = arith.constant 0 : index
    %246 = vector.load %arg11[%c0_85, %c0_86] : memref<4x16xf32, #tpu.memory_space<vmem>>, vector<4x16xf32>
    tpu.vector_store %arg11[%c0_85, %c0_86], %245 {strides = array<i32>} : memref<4x16xf32, #tpu.memory_space<vmem>>, vector<4x16xf32>,
    %247 = vector.extract_strided_slice %245 {offsets = [0, 0], sizes = [2, 16], strides = [1, 1]} : vector<4x16xf32> to vector<2x16xf32>
    %c2_87 = arith.constant 2 : index
    %c0_88 = arith.constant 0 : index
    %c0_89 = arith.constant 0 : index
    %248 = vector.load %arg9[%c2_87, %c0_88, %c0_89] : memref<8x2x16xf32, #tpu.memory_space<vmem>>, vector<1x2x16xf32>
    %249 = vector.shape_cast %248 : vector<1x2x16xf32> to vector<2x16xf32>
    %250 = vector.shape_cast %247 : vector<2x16xf32> to vector<1x2x16xf32>
    tpu.vector_store %arg9[%c2_87, %c0_88, %c0_89], %250 {strides = array<i32>} : memref<8x2x16xf32, #tpu.memory_space<vmem>>, vector<1x2x16xf32>,
    %251 = vector.extract_strided_slice %245 {offsets = [2, 0], sizes = [2, 16], strides = [1, 1]} : vector<4x16xf32> to vector<2x16xf32>
    %c5_90 = arith.constant 5 : index
    %c0_91 = arith.constant 0 : index
    %c0_92 = arith.constant 0 : index
    %252 = vector.load %arg10[%c5_90, %c0_91, %c0_92] : memref<8x2x16xf32, #tpu.memory_space<vmem>>, vector<1x2x16xf32>
    %253 = vector.shape_cast %252 : vector<1x2x16xf32> to vector<2x16xf32>
    %254 = vector.shape_cast %251 : vector<2x16xf32> to vector<1x2x16xf32>
    tpu.vector_store %arg10[%c5_90, %c0_91, %c0_92], %254 {strides = array<i32>} : memref<8x2x16xf32, #tpu.memory_space<vmem>>, vector<1x2x16xf32>,
    %c0_93 = arith.constant 0 : index
    %c0_94 = arith.constant 0 : index
    %255 = vector.load %arg11[%c0_93, %c0_94] : memref<4x16xf32, #tpu.memory_space<vmem>>, vector<4x16xf32>
    %cst_95 = arith.constant dense<0.000000e+00> : vector<4x48xf32>
    %256 = tpu.matmul %255, %3, %cst_95 {dimension_numbers = #tpu.dot_dimension_numbers<[1], [0], [0], [1], [0, 0, 1, 1], [], []>} : vector<4x16xf32>, vector<16x48xf32>, vector<4x48xf32> -> vector<4x48xf32>
    %257 = vector.broadcast %4 : vector<1x48xf32> to vector<4x48xf32>
    %258 = arith.addf %256, %257 : vector<4x48xf32>
    %259 = vector.extract_strided_slice %258 {offsets = [0, 0], sizes = [4, 32], strides = [1, 1]} : vector<4x48xf32> to vector<4x32xf32>
    %cst_96 = arith.constant dense<0.000000e+00> : vector<4xf32>
    %260 = vector.multi_reduction <add>, %259, %cst_96 [1] : vector<4x32xf32> to vector<4xf32>
    %261 = vector.shape_cast %260 : vector<4xf32> to vector<4x1xf32>
    %cst_97 = arith.constant 3.200000e+01 : f32
    %262 = vector.broadcast %cst_97 : f32 to vector<4x1xf32>
    %263 = arith.divf %261, %262 : vector<4x1xf32>
    %264 = arith.mulf %259, %259 : vector<4x32xf32>
    %cst_98 = arith.constant dense<0.000000e+00> : vector<4xf32>
    %265 = vector.multi_reduction <add>, %264, %cst_98 [1] : vector<4x32xf32> to vector<4xf32>
    %266 = vector.shape_cast %265 : vector<4xf32> to vector<4x1xf32>
    %cst_99 = arith.constant 3.200000e+01 : f32
    %267 = vector.broadcast %cst_99 : f32 to vector<4x1xf32>
    %268 = arith.divf %266, %267 : vector<4x1xf32>
    %269 = arith.mulf %263, %263 : vector<4x1xf32>
    %270 = arith.subf %268, %269 : vector<4x1xf32>
    %271 = vector.broadcast %263 : vector<4x1xf32> to vector<4x32xf32>
    %272 = arith.subf %259, %271 : vector<4x32xf32>
    %cst_100 = arith.constant 9.99999974E-6 : f32
    %273 = vector.broadcast %cst_100 : f32 to vector<4x1xf32>
    %274 = arith.addf %270, %273 : vector<4x1xf32>
    %275 = math.rsqrt %274 : vector<4x1xf32>
    %276 = vector.broadcast %275 : vector<4x1xf32> to vector<4x32xf32>
    %277 = arith.mulf %272, %276 : vector<4x32xf32>
    %278 = vector.broadcast %5 : vector<1x32xf32> to vector<4x32xf32>
    %279 = arith.mulf %277, %278 : vector<4x32xf32>
    %280 = vector.broadcast %6 : vector<1x32xf32> to vector<4x32xf32>
    %281 = arith.addf %279, %280 : vector<4x32xf32>
    %282 = vector.extract_strided_slice %258 {offsets = [0, 32], sizes = [4, 16], strides = [1, 1]} : vector<4x48xf32> to vector<4x16xf32>
    %cst_101 = arith.constant dense<0.000000e+00> : vector<4xf32>
    %283 = vector.multi_reduction <add>, %282, %cst_101 [1] : vector<4x16xf32> to vector<4xf32>
    %284 = vector.shape_cast %283 : vector<4xf32> to vector<4x1xf32>
    %cst_102 = arith.constant 1.600000e+01 : f32
    %285 = vector.broadcast %cst_102 : f32 to vector<4x1xf32>
    %286 = arith.divf %284, %285 : vector<4x1xf32>
    %287 = arith.mulf %282, %282 : vector<4x16xf32>
    %cst_103 = arith.constant dense<0.000000e+00> : vector<4xf32>
    %288 = vector.multi_reduction <add>, %287, %cst_103 [1] : vector<4x16xf32> to vector<4xf32>
    %289 = vector.shape_cast %288 : vector<4xf32> to vector<4x1xf32>
    %cst_104 = arith.constant 1.600000e+01 : f32
    %290 = vector.broadcast %cst_104 : f32 to vector<4x1xf32>
    %291 = arith.divf %289, %290 : vector<4x1xf32>
    %292 = arith.mulf %286, %286 : vector<4x1xf32>
    %293 = arith.subf %291, %292 : vector<4x1xf32>
    %294 = vector.broadcast %286 : vector<4x1xf32> to vector<4x16xf32>
    %295 = arith.subf %282, %294 : vector<4x16xf32>
    %cst_105 = arith.constant 9.99999974E-6 : f32
    %296 = vector.broadcast %cst_105 : f32 to vector<4x1xf32>
    %297 = arith.addf %293, %296 : vector<4x1xf32>
    %298 = math.rsqrt %297 : vector<4x1xf32>
    %299 = vector.broadcast %298 : vector<4x1xf32> to vector<4x16xf32>
    %300 = arith.mulf %295, %299 : vector<4x16xf32>
    %301 = vector.broadcast %7 : vector<1x16xf32> to vector<4x16xf32>
    %302 = arith.mulf %300, %301 : vector<4x16xf32>
    %303 = vector.broadcast %8 : vector<1x16xf32> to vector<4x16xf32>
    %304 = arith.addf %302, %303 : vector<4x16xf32>
    %c3 = arith.constant 3 : index
    %c0_106 = arith.constant 0 : index
    %c0_107 = arith.constant 0 : index
    %305 = vector.load %arg1[%c3, %c0_106, %c0_107] : memref<8x2x48xf32, #tpu.memory_space<vmem>>, vector<1x2x48xf32>
    %306 = vector.shape_cast %305 : vector<1x2x48xf32> to vector<2x48xf32>
    %c4 = arith.constant 4 : index
    %c0_108 = arith.constant 0 : index
    %c0_109 = arith.constant 0 : index
    %307 = vector.load %arg2[%c4, %c0_108, %c0_109] : memref<8x2x48xf32, #tpu.memory_space<vmem>>, vector<1x2x48xf32>
    %308 = vector.shape_cast %307 : vector<1x2x48xf32> to vector<2x48xf32>
    %309 = tpu.concatenate %306, %308 in 0 : vector<2x48xf32>, vector<2x48xf32> -> vector<4x48xf32>
    %310 = vector.extract_strided_slice %309 {offsets = [0, 0], sizes = [4, 32], strides = [1, 1]} : vector<4x48xf32> to vector<4x32xf32>
    %311 = arith.addf %310, %281 : vector<4x32xf32>
    %312 = arith.negf %311 : vector<4x32xf32>
    %313 = math.exp %312 : vector<4x32xf32>
    %cst_110 = arith.constant 1.000000e+00 : f32
    %314 = vector.broadcast %cst_110 : f32 to vector<4x32xf32>
    %315 = arith.addf %314, %313 : vector<4x32xf32>
    %316 = arith.divf %314, %315 : vector<4x32xf32>
    %317 = vector.extract_strided_slice %316 {offsets = [0, 0], sizes = [4, 16], strides = [1, 1]} : vector<4x32xf32> to vector<4x16xf32>
    %318 = vector.extract_strided_slice %316 {offsets = [0, 16], sizes = [4, 16], strides = [1, 1]} : vector<4x32xf32> to vector<4x16xf32>
    %319 = vector.extract_strided_slice %309 {offsets = [0, 32], sizes = [4, 16], strides = [1, 1]} : vector<4x48xf32> to vector<4x16xf32>
    %320 = arith.mulf %317, %304 : vector<4x16xf32>
    %321 = arith.addf %319, %320 : vector<4x16xf32>
    %322 = math.tanh %321 : vector<4x16xf32>
    %cst_111 = arith.constant 1.000000e+00 : f32
    %323 = vector.broadcast %cst_111 : f32 to vector<4x16xf32>
    %324 = arith.subf %323, %318 : vector<4x16xf32>
    %325 = arith.mulf %324, %322 : vector<4x16xf32>
    %326 = arith.mulf %318, %255 : vector<4x16xf32>
    %327 = arith.addf %325, %326 : vector<4x16xf32>
    %c0_112 = arith.constant 0 : index
    %c0_113 = arith.constant 0 : index
    %328 = vector.load %arg11[%c0_112, %c0_113] : memref<4x16xf32, #tpu.memory_space<vmem>>, vector<4x16xf32>
    tpu.vector_store %arg11[%c0_112, %c0_113], %327 {strides = array<i32>} : memref<4x16xf32, #tpu.memory_space<vmem>>, vector<4x16xf32>,
    %329 = vector.extract_strided_slice %327 {offsets = [0, 0], sizes = [2, 16], strides = [1, 1]} : vector<4x16xf32> to vector<2x16xf32>
    %c3_114 = arith.constant 3 : index
    %c0_115 = arith.constant 0 : index
    %c0_116 = arith.constant 0 : index
    %330 = vector.load %arg9[%c3_114, %c0_115, %c0_116] : memref<8x2x16xf32, #tpu.memory_space<vmem>>, vector<1x2x16xf32>
    %331 = vector.shape_cast %330 : vector<1x2x16xf32> to vector<2x16xf32>
    %332 = vector.shape_cast %329 : vector<2x16xf32> to vector<1x2x16xf32>
    tpu.vector_store %arg9[%c3_114, %c0_115, %c0_116], %332 {strides = array<i32>} : memref<8x2x16xf32, #tpu.memory_space<vmem>>, vector<1x2x16xf32>,
    %333 = vector.extract_strided_slice %327 {offsets = [2, 0], sizes = [2, 16], strides = [1, 1]} : vector<4x16xf32> to vector<2x16xf32>
    %c4_117 = arith.constant 4 : index
    %c0_118 = arith.constant 0 : index
    %c0_119 = arith.constant 0 : index
    %334 = vector.load %arg10[%c4_117, %c0_118, %c0_119] : memref<8x2x16xf32, #tpu.memory_space<vmem>>, vector<1x2x16xf32>
    %335 = vector.shape_cast %334 : vector<1x2x16xf32> to vector<2x16xf32>
    %336 = vector.shape_cast %333 : vector<2x16xf32> to vector<1x2x16xf32>
    tpu.vector_store %arg10[%c4_117, %c0_118, %c0_119], %336 {strides = array<i32>} : memref<8x2x16xf32, #tpu.memory_space<vmem>>, vector<1x2x16xf32>,
    %c0_120 = arith.constant 0 : index
    %c0_121 = arith.constant 0 : index
    %337 = vector.load %arg11[%c0_120, %c0_121] : memref<4x16xf32, #tpu.memory_space<vmem>>, vector<4x16xf32>
    %cst_122 = arith.constant dense<0.000000e+00> : vector<4x48xf32>
    %338 = tpu.matmul %337, %3, %cst_122 {dimension_numbers = #tpu.dot_dimension_numbers<[1], [0], [0], [1], [0, 0, 1, 1], [], []>} : vector<4x16xf32>, vector<16x48xf32>, vector<4x48xf32> -> vector<4x48xf32>
    %339 = vector.broadcast %4 : vector<1x48xf32> to vector<4x48xf32>
    %340 = arith.addf %338, %339 : vector<4x48xf32>
    %341 = vector.extract_strided_slice %340 {offsets = [0, 0], sizes = [4, 32], strides = [1, 1]} : vector<4x48xf32> to vector<4x32xf32>
    %cst_123 = arith.constant dense<0.000000e+00> : vector<4xf32>
    %342 = vector.multi_reduction <add>, %341, %cst_123 [1] : vector<4x32xf32> to vector<4xf32>
    %343 = vector.shape_cast %342 : vector<4xf32> to vector<4x1xf32>
    %cst_124 = arith.constant 3.200000e+01 : f32
    %344 = vector.broadcast %cst_124 : f32 to vector<4x1xf32>
    %345 = arith.divf %343, %344 : vector<4x1xf32>
    %346 = arith.mulf %341, %341 : vector<4x32xf32>
    %cst_125 = arith.constant dense<0.000000e+00> : vector<4xf32>
    %347 = vector.multi_reduction <add>, %346, %cst_125 [1] : vector<4x32xf32> to vector<4xf32>
    %348 = vector.shape_cast %347 : vector<4xf32> to vector<4x1xf32>
    %cst_126 = arith.constant 3.200000e+01 : f32
    %349 = vector.broadcast %cst_126 : f32 to vector<4x1xf32>
    %350 = arith.divf %348, %349 : vector<4x1xf32>
    %351 = arith.mulf %345, %345 : vector<4x1xf32>
    %352 = arith.subf %350, %351 : vector<4x1xf32>
    %353 = vector.broadcast %345 : vector<4x1xf32> to vector<4x32xf32>
    %354 = arith.subf %341, %353 : vector<4x32xf32>
    %cst_127 = arith.constant 9.99999974E-6 : f32
    %355 = vector.broadcast %cst_127 : f32 to vector<4x1xf32>
    %356 = arith.addf %352, %355 : vector<4x1xf32>
    %357 = math.rsqrt %356 : vector<4x1xf32>
    %358 = vector.broadcast %357 : vector<4x1xf32> to vector<4x32xf32>
    %359 = arith.mulf %354, %358 : vector<4x32xf32>
    %360 = vector.broadcast %5 : vector<1x32xf32> to vector<4x32xf32>
    %361 = arith.mulf %359, %360 : vector<4x32xf32>
    %362 = vector.broadcast %6 : vector<1x32xf32> to vector<4x32xf32>
    %363 = arith.addf %361, %362 : vector<4x32xf32>
    %364 = vector.extract_strided_slice %340 {offsets = [0, 32], sizes = [4, 16], strides = [1, 1]} : vector<4x48xf32> to vector<4x16xf32>
    %cst_128 = arith.constant dense<0.000000e+00> : vector<4xf32>
    %365 = vector.multi_reduction <add>, %364, %cst_128 [1] : vector<4x16xf32> to vector<4xf32>
    %366 = vector.shape_cast %365 : vector<4xf32> to vector<4x1xf32>
    %cst_129 = arith.constant 1.600000e+01 : f32
    %367 = vector.broadcast %cst_129 : f32 to vector<4x1xf32>
    %368 = arith.divf %366, %367 : vector<4x1xf32>
    %369 = arith.mulf %364, %364 : vector<4x16xf32>
    %cst_130 = arith.constant dense<0.000000e+00> : vector<4xf32>
    %370 = vector.multi_reduction <add>, %369, %cst_130 [1] : vector<4x16xf32> to vector<4xf32>
    %371 = vector.shape_cast %370 : vector<4xf32> to vector<4x1xf32>
    %cst_131 = arith.constant 1.600000e+01 : f32
    %372 = vector.broadcast %cst_131 : f32 to vector<4x1xf32>
    %373 = arith.divf %371, %372 : vector<4x1xf32>
    %374 = arith.mulf %368, %368 : vector<4x1xf32>
    %375 = arith.subf %373, %374 : vector<4x1xf32>
    %376 = vector.broadcast %368 : vector<4x1xf32> to vector<4x16xf32>
    %377 = arith.subf %364, %376 : vector<4x16xf32>
    %cst_132 = arith.constant 9.99999974E-6 : f32
    %378 = vector.broadcast %cst_132 : f32 to vector<4x1xf32>
    %379 = arith.addf %375, %378 : vector<4x1xf32>
    %380 = math.rsqrt %379 : vector<4x1xf32>
    %381 = vector.broadcast %380 : vector<4x1xf32> to vector<4x16xf32>
    %382 = arith.mulf %377, %381 : vector<4x16xf32>
    %383 = vector.broadcast %7 : vector<1x16xf32> to vector<4x16xf32>
    %384 = arith.mulf %382, %383 : vector<4x16xf32>
    %385 = vector.broadcast %8 : vector<1x16xf32> to vector<4x16xf32>
    %386 = arith.addf %384, %385 : vector<4x16xf32>
    %c4_133 = arith.constant 4 : index
    %c0_134 = arith.constant 0 : index
    %c0_135 = arith.constant 0 : index
    %387 = vector.load %arg1[%c4_133, %c0_134, %c0_135] : memref<8x2x48xf32, #tpu.memory_space<vmem>>, vector<1x2x48xf32>
    %388 = vector.shape_cast %387 : vector<1x2x48xf32> to vector<2x48xf32>
    %c3_136 = arith.constant 3 : index
    %c0_137 = arith.constant 0 : index
    %c0_138 = arith.constant 0 : index
    %389 = vector.load %arg2[%c3_136, %c0_137, %c0_138] : memref<8x2x48xf32, #tpu.memory_space<vmem>>, vector<1x2x48xf32>
    %390 = vector.shape_cast %389 : vector<1x2x48xf32> to vector<2x48xf32>
    %391 = tpu.concatenate %388, %390 in 0 : vector<2x48xf32>, vector<2x48xf32> -> vector<4x48xf32>
    %392 = vector.extract_strided_slice %391 {offsets = [0, 0], sizes = [4, 32], strides = [1, 1]} : vector<4x48xf32> to vector<4x32xf32>
    %393 = arith.addf %392, %363 : vector<4x32xf32>
    %394 = arith.negf %393 : vector<4x32xf32>
    %395 = math.exp %394 : vector<4x32xf32>
    %cst_139 = arith.constant 1.000000e+00 : f32
    %396 = vector.broadcast %cst_139 : f32 to vector<4x32xf32>
    %397 = arith.addf %396, %395 : vector<4x32xf32>
    %398 = arith.divf %396, %397 : vector<4x32xf32>
    %399 = vector.extract_strided_slice %398 {offsets = [0, 0], sizes = [4, 16], strides = [1, 1]} : vector<4x32xf32> to vector<4x16xf32>
    %400 = vector.extract_strided_slice %398 {offsets = [0, 16], sizes = [4, 16], strides = [1, 1]} : vector<4x32xf32> to vector<4x16xf32>
    %401 = vector.extract_strided_slice %391 {offsets = [0, 32], sizes = [4, 16], strides = [1, 1]} : vector<4x48xf32> to vector<4x16xf32>
    %402 = arith.mulf %399, %386 : vector<4x16xf32>
    %403 = arith.addf %401, %402 : vector<4x16xf32>
    %404 = math.tanh %403 : vector<4x16xf32>
    %cst_140 = arith.constant 1.000000e+00 : f32
    %405 = vector.broadcast %cst_140 : f32 to vector<4x16xf32>
    %406 = arith.subf %405, %400 : vector<4x16xf32>
    %407 = arith.mulf %406, %404 : vector<4x16xf32>
    %408 = arith.mulf %400, %337 : vector<4x16xf32>
    %409 = arith.addf %407, %408 : vector<4x16xf32>
    %c0_141 = arith.constant 0 : index
    %c0_142 = arith.constant 0 : index
    %410 = vector.load %arg11[%c0_141, %c0_142] : memref<4x16xf32, #tpu.memory_space<vmem>>, vector<4x16xf32>
    tpu.vector_store %arg11[%c0_141, %c0_142], %409 {strides = array<i32>} : memref<4x16xf32, #tpu.memory_space<vmem>>, vector<4x16xf32>,
    %411 = vector.extract_strided_slice %409 {offsets = [0, 0], sizes = [2, 16], strides = [1, 1]} : vector<4x16xf32> to vector<2x16xf32>
    %c4_143 = arith.constant 4 : index
    %c0_144 = arith.constant 0 : index
    %c0_145 = arith.constant 0 : index
    %412 = vector.load %arg9[%c4_143, %c0_144, %c0_145] : memref<8x2x16xf32, #tpu.memory_space<vmem>>, vector<1x2x16xf32>
    %413 = vector.shape_cast %412 : vector<1x2x16xf32> to vector<2x16xf32>
    %414 = vector.shape_cast %411 : vector<2x16xf32> to vector<1x2x16xf32>
    tpu.vector_store %arg9[%c4_143, %c0_144, %c0_145], %414 {strides = array<i32>} : memref<8x2x16xf32, #tpu.memory_space<vmem>>, vector<1x2x16xf32>,
    %415 = vector.extract_strided_slice %409 {offsets = [2, 0], sizes = [2, 16], strides = [1, 1]} : vector<4x16xf32> to vector<2x16xf32>
    %c3_146 = arith.constant 3 : index
    %c0_147 = arith.constant 0 : index
    %c0_148 = arith.constant 0 : index
    %416 = vector.load %arg10[%c3_146, %c0_147, %c0_148] : memref<8x2x16xf32, #tpu.memory_space<vmem>>, vector<1x2x16xf32>
    %417 = vector.shape_cast %416 : vector<1x2x16xf32> to vector<2x16xf32>
    %418 = vector.shape_cast %415 : vector<2x16xf32> to vector<1x2x16xf32>
    tpu.vector_store %arg10[%c3_146, %c0_147, %c0_148], %418 {strides = array<i32>} : memref<8x2x16xf32, #tpu.memory_space<vmem>>, vector<1x2x16xf32>,
    %c0_149 = arith.constant 0 : index
    %c0_150 = arith.constant 0 : index
    %419 = vector.load %arg11[%c0_149, %c0_150] : memref<4x16xf32, #tpu.memory_space<vmem>>, vector<4x16xf32>
    %cst_151 = arith.constant dense<0.000000e+00> : vector<4x48xf32>
    %420 = tpu.matmul %419, %3, %cst_151 {dimension_numbers = #tpu.dot_dimension_numbers<[1], [0], [0], [1], [0, 0, 1, 1], [], []>} : vector<4x16xf32>, vector<16x48xf32>, vector<4x48xf32> -> vector<4x48xf32>
    %421 = vector.broadcast %4 : vector<1x48xf32> to vector<4x48xf32>
    %422 = arith.addf %420, %421 : vector<4x48xf32>
    %423 = vector.extract_strided_slice %422 {offsets = [0, 0], sizes = [4, 32], strides = [1, 1]} : vector<4x48xf32> to vector<4x32xf32>
    %cst_152 = arith.constant dense<0.000000e+00> : vector<4xf32>
    %424 = vector.multi_reduction <add>, %423, %cst_152 [1] : vector<4x32xf32> to vector<4xf32>
    %425 = vector.shape_cast %424 : vector<4xf32> to vector<4x1xf32>
    %cst_153 = arith.constant 3.200000e+01 : f32
    %426 = vector.broadcast %cst_153 : f32 to vector<4x1xf32>
    %427 = arith.divf %425, %426 : vector<4x1xf32>
    %428 = arith.mulf %423, %423 : vector<4x32xf32>
    %cst_154 = arith.constant dense<0.000000e+00> : vector<4xf32>
    %429 = vector.multi_reduction <add>, %428, %cst_154 [1] : vector<4x32xf32> to vector<4xf32>
    %430 = vector.shape_cast %429 : vector<4xf32> to vector<4x1xf32>
    %cst_155 = arith.constant 3.200000e+01 : f32
    %431 = vector.broadcast %cst_155 : f32 to vector<4x1xf32>
    %432 = arith.divf %430, %431 : vector<4x1xf32>
    %433 = arith.mulf %427, %427 : vector<4x1xf32>
    %434 = arith.subf %432, %433 : vector<4x1xf32>
    %435 = vector.broadcast %427 : vector<4x1xf32> to vector<4x32xf32>
    %436 = arith.subf %423, %435 : vector<4x32xf32>
    %cst_156 = arith.constant 9.99999974E-6 : f32
    %437 = vector.broadcast %cst_156 : f32 to vector<4x1xf32>
    %438 = arith.addf %434, %437 : vector<4x1xf32>
    %439 = math.rsqrt %438 : vector<4x1xf32>
    %440 = vector.broadcast %439 : vector<4x1xf32> to vector<4x32xf32>
    %441 = arith.mulf %436, %440 : vector<4x32xf32>
    %442 = vector.broadcast %5 : vector<1x32xf32> to vector<4x32xf32>
    %443 = arith.mulf %441, %442 : vector<4x32xf32>
    %444 = vector.broadcast %6 : vector<1x32xf32> to vector<4x32xf32>
    %445 = arith.addf %443, %444 : vector<4x32xf32>
    %446 = vector.extract_strided_slice %422 {offsets = [0, 32], sizes = [4, 16], strides = [1, 1]} : vector<4x48xf32> to vector<4x16xf32>
    %cst_157 = arith.constant dense<0.000000e+00> : vector<4xf32>
    %447 = vector.multi_reduction <add>, %446, %cst_157 [1] : vector<4x16xf32> to vector<4xf32>
    %448 = vector.shape_cast %447 : vector<4xf32> to vector<4x1xf32>
    %cst_158 = arith.constant 1.600000e+01 : f32
    %449 = vector.broadcast %cst_158 : f32 to vector<4x1xf32>
    %450 = arith.divf %448, %449 : vector<4x1xf32>
    %451 = arith.mulf %446, %446 : vector<4x16xf32>
    %cst_159 = arith.constant dense<0.000000e+00> : vector<4xf32>
    %452 = vector.multi_reduction <add>, %451, %cst_159 [1] : vector<4x16xf32> to vector<4xf32>
    %453 = vector.shape_cast %452 : vector<4xf32> to vector<4x1xf32>
    %cst_160 = arith.constant 1.600000e+01 : f32
    %454 = vector.broadcast %cst_160 : f32 to vector<4x1xf32>
    %455 = arith.divf %453, %454 : vector<4x1xf32>
    %456 = arith.mulf %450, %450 : vector<4x1xf32>
    %457 = arith.subf %455, %456 : vector<4x1xf32>
    %458 = vector.broadcast %450 : vector<4x1xf32> to vector<4x16xf32>
    %459 = arith.subf %446, %458 : vector<4x16xf32>
    %cst_161 = arith.constant 9.99999974E-6 : f32
    %460 = vector.broadcast %cst_161 : f32 to vector<4x1xf32>
    %461 = arith.addf %457, %460 : vector<4x1xf32>
    %462 = math.rsqrt %461 : vector<4x1xf32>
    %463 = vector.broadcast %462 : vector<4x1xf32> to vector<4x16xf32>
    %464 = arith.mulf %459, %463 : vector<4x16xf32>
    %465 = vector.broadcast %7 : vector<1x16xf32> to vector<4x16xf32>
    %466 = arith.mulf %464, %465 : vector<4x16xf32>
    %467 = vector.broadcast %8 : vector<1x16xf32> to vector<4x16xf32>
    %468 = arith.addf %466, %467 : vector<4x16xf32>
    %c5_162 = arith.constant 5 : index
    %c0_163 = arith.constant 0 : index
    %c0_164 = arith.constant 0 : index
    %469 = vector.load %arg1[%c5_162, %c0_163, %c0_164] : memref<8x2x48xf32, #tpu.memory_space<vmem>>, vector<1x2x48xf32>
    %470 = vector.shape_cast %469 : vector<1x2x48xf32> to vector<2x48xf32>
    %c2_165 = arith.constant 2 : index
    %c0_166 = arith.constant 0 : index
    %c0_167 = arith.constant 0 : index
    %471 = vector.load %arg2[%c2_165, %c0_166, %c0_167] : memref<8x2x48xf32, #tpu.memory_space<vmem>>, vector<1x2x48xf32>
    %472 = vector.shape_cast %471 : vector<1x2x48xf32> to vector<2x48xf32>
    %473 = tpu.concatenate %470, %472 in 0 : vector<2x48xf32>, vector<2x48xf32> -> vector<4x48xf32>
    %474 = vector.extract_strided_slice %473 {offsets = [0, 0], sizes = [4, 32], strides = [1, 1]} : vector<4x48xf32> to vector<4x32xf32>
    %475 = arith.addf %474, %445 : vector<4x32xf32>
    %476 = arith.negf %475 : vector<4x32xf32>
    %477 = math.exp %476 : vector<4x32xf32>
    %cst_168 = arith.constant 1.000000e+00 : f32
    %478 = vector.broadcast %cst_168 : f32 to vector<4x32xf32>
    %479 = arith.addf %478, %477 : vector<4x32xf32>
    %480 = arith.divf %478, %479 : vector<4x32xf32>
    %481 = vector.extract_strided_slice %480 {offsets = [0, 0], sizes = [4, 16], strides = [1, 1]} : vector<4x32xf32> to vector<4x16xf32>
    %482 = vector.extract_strided_slice %480 {offsets = [0, 16], sizes = [4, 16], strides = [1, 1]} : vector<4x32xf32> to vector<4x16xf32>
    %483 = vector.extract_strided_slice %473 {offsets = [0, 32], sizes = [4, 16], strides = [1, 1]} : vector<4x48xf32> to vector<4x16xf32>
    %484 = arith.mulf %481, %468 : vector<4x16xf32>
    %485 = arith.addf %483, %484 : vector<4x16xf32>
    %486 = math.tanh %485 : vector<4x16xf32>
    %cst_169 = arith.constant 1.000000e+00 : f32
    %487 = vector.broadcast %cst_169 : f32 to vector<4x16xf32>
    %488 = arith.subf %487, %482 : vector<4x16xf32>
    %489 = arith.mulf %488, %486 : vector<4x16xf32>
    %490 = arith.mulf %482, %419 : vector<4x16xf32>
    %491 = arith.addf %489, %490 : vector<4x16xf32>
    %c0_170 = arith.constant 0 : index
    %c0_171 = arith.constant 0 : index
    %492 = vector.load %arg11[%c0_170, %c0_171] : memref<4x16xf32, #tpu.memory_space<vmem>>, vector<4x16xf32>
    tpu.vector_store %arg11[%c0_170, %c0_171], %491 {strides = array<i32>} : memref<4x16xf32, #tpu.memory_space<vmem>>, vector<4x16xf32>,
    %493 = vector.extract_strided_slice %491 {offsets = [0, 0], sizes = [2, 16], strides = [1, 1]} : vector<4x16xf32> to vector<2x16xf32>
    %c5_172 = arith.constant 5 : index
    %c0_173 = arith.constant 0 : index
    %c0_174 = arith.constant 0 : index
    %494 = vector.load %arg9[%c5_172, %c0_173, %c0_174] : memref<8x2x16xf32, #tpu.memory_space<vmem>>, vector<1x2x16xf32>
    %495 = vector.shape_cast %494 : vector<1x2x16xf32> to vector<2x16xf32>
    %496 = vector.shape_cast %493 : vector<2x16xf32> to vector<1x2x16xf32>
    tpu.vector_store %arg9[%c5_172, %c0_173, %c0_174], %496 {strides = array<i32>} : memref<8x2x16xf32, #tpu.memory_space<vmem>>, vector<1x2x16xf32>,
    %497 = vector.extract_strided_slice %491 {offsets = [2, 0], sizes = [2, 16], strides = [1, 1]} : vector<4x16xf32> to vector<2x16xf32>
    %c2_175 = arith.constant 2 : index
    %c0_176 = arith.constant 0 : index
    %c0_177 = arith.constant 0 : index
    %498 = vector.load %arg10[%c2_175, %c0_176, %c0_177] : memref<8x2x16xf32, #tpu.memory_space<vmem>>, vector<1x2x16xf32>
    %499 = vector.shape_cast %498 : vector<1x2x16xf32> to vector<2x16xf32>
    %500 = vector.shape_cast %497 : vector<2x16xf32> to vector<1x2x16xf32>
    tpu.vector_store %arg10[%c2_175, %c0_176, %c0_177], %500 {strides = array<i32>} : memref<8x2x16xf32, #tpu.memory_space<vmem>>, vector<1x2x16xf32>,
    %c0_178 = arith.constant 0 : index
    %c0_179 = arith.constant 0 : index
    %501 = vector.load %arg11[%c0_178, %c0_179] : memref<4x16xf32, #tpu.memory_space<vmem>>, vector<4x16xf32>
    %cst_180 = arith.constant dense<0.000000e+00> : vector<4x48xf32>
    %502 = tpu.matmul %501, %3, %cst_180 {dimension_numbers = #tpu.dot_dimension_numbers<[1], [0], [0], [1], [0, 0, 1, 1], [], []>} : vector<4x16xf32>, vector<16x48xf32>, vector<4x48xf32> -> vector<4x48xf32>
    %503 = vector.broadcast %4 : vector<1x48xf32> to vector<4x48xf32>
    %504 = arith.addf %502, %503 : vector<4x48xf32>
    %505 = vector.extract_strided_slice %504 {offsets = [0, 0], sizes = [4, 32], strides = [1, 1]} : vector<4x48xf32> to vector<4x32xf32>
    %cst_181 = arith.constant dense<0.000000e+00> : vector<4xf32>
    %506 = vector.multi_reduction <add>, %505, %cst_181 [1] : vector<4x32xf32> to vector<4xf32>
    %507 = vector.shape_cast %506 : vector<4xf32> to vector<4x1xf32>
    %cst_182 = arith.constant 3.200000e+01 : f32
    %508 = vector.broadcast %cst_182 : f32 to vector<4x1xf32>
    %509 = arith.divf %507, %508 : vector<4x1xf32>
    %510 = arith.mulf %505, %505 : vector<4x32xf32>
    %cst_183 = arith.constant dense<0.000000e+00> : vector<4xf32>
    %511 = vector.multi_reduction <add>, %510, %cst_183 [1] : vector<4x32xf32> to vector<4xf32>
    %512 = vector.shape_cast %511 : vector<4xf32> to vector<4x1xf32>
    %cst_184 = arith.constant 3.200000e+01 : f32
    %513 = vector.broadcast %cst_184 : f32 to vector<4x1xf32>
    %514 = arith.divf %512, %513 : vector<4x1xf32>
    %515 = arith.mulf %509, %509 : vector<4x1xf32>
    %516 = arith.subf %514, %515 : vector<4x1xf32>
    %517 = vector.broadcast %509 : vector<4x1xf32> to vector<4x32xf32>
    %518 = arith.subf %505, %517 : vector<4x32xf32>
    %cst_185 = arith.constant 9.99999974E-6 : f32
    %519 = vector.broadcast %cst_185 : f32 to vector<4x1xf32>
    %520 = arith.addf %516, %519 : vector<4x1xf32>
    %521 = math.rsqrt %520 : vector<4x1xf32>
    %522 = vector.broadcast %521 : vector<4x1xf32> to vector<4x32xf32>
    %523 = arith.mulf %518, %522 : vector<4x32xf32>
    %524 = vector.broadcast %5 : vector<1x32xf32> to vector<4x32xf32>
    %525 = arith.mulf %523, %524 : vector<4x32xf32>
    %526 = vector.broadcast %6 : vector<1x32xf32> to vector<4x32xf32>
    %527 = arith.addf %525, %526 : vector<4x32xf32>
    %528 = vector.extract_strided_slice %504 {offsets = [0, 32], sizes = [4, 16], strides = [1, 1]} : vector<4x48xf32> to vector<4x16xf32>
    %cst_186 = arith.constant dense<0.000000e+00> : vector<4xf32>
    %529 = vector.multi_reduction <add>, %528, %cst_186 [1] : vector<4x16xf32> to vector<4xf32>
    %530 = vector.shape_cast %529 : vector<4xf32> to vector<4x1xf32>
    %cst_187 = arith.constant 1.600000e+01 : f32
    %531 = vector.broadcast %cst_187 : f32 to vector<4x1xf32>
    %532 = arith.divf %530, %531 : vector<4x1xf32>
    %533 = arith.mulf %528, %528 : vector<4x16xf32>
    %cst_188 = arith.constant dense<0.000000e+00> : vector<4xf32>
    %534 = vector.multi_reduction <add>, %533, %cst_188 [1] : vector<4x16xf32> to vector<4xf32>
    %535 = vector.shape_cast %534 : vector<4xf32> to vector<4x1xf32>
    %cst_189 = arith.constant 1.600000e+01 : f32
    %536 = vector.broadcast %cst_189 : f32 to vector<4x1xf32>
    %537 = arith.divf %535, %536 : vector<4x1xf32>
    %538 = arith.mulf %532, %532 : vector<4x1xf32>
    %539 = arith.subf %537, %538 : vector<4x1xf32>
    %540 = vector.broadcast %532 : vector<4x1xf32> to vector<4x16xf32>
    %541 = arith.subf %528, %540 : vector<4x16xf32>
    %cst_190 = arith.constant 9.99999974E-6 : f32
    %542 = vector.broadcast %cst_190 : f32 to vector<4x1xf32>
    %543 = arith.addf %539, %542 : vector<4x1xf32>
    %544 = math.rsqrt %543 : vector<4x1xf32>
    %545 = vector.broadcast %544 : vector<4x1xf32> to vector<4x16xf32>
    %546 = arith.mulf %541, %545 : vector<4x16xf32>
    %547 = vector.broadcast %7 : vector<1x16xf32> to vector<4x16xf32>
    %548 = arith.mulf %546, %547 : vector<4x16xf32>
    %549 = vector.broadcast %8 : vector<1x16xf32> to vector<4x16xf32>
    %550 = arith.addf %548, %549 : vector<4x16xf32>
    %c6_191 = arith.constant 6 : index
    %c0_192 = arith.constant 0 : index
    %c0_193 = arith.constant 0 : index
    %551 = vector.load %arg1[%c6_191, %c0_192, %c0_193] : memref<8x2x48xf32, #tpu.memory_space<vmem>>, vector<1x2x48xf32>
    %552 = vector.shape_cast %551 : vector<1x2x48xf32> to vector<2x48xf32>
    %c1_194 = arith.constant 1 : index
    %c0_195 = arith.constant 0 : index
    %c0_196 = arith.constant 0 : index
    %553 = vector.load %arg2[%c1_194, %c0_195, %c0_196] : memref<8x2x48xf32, #tpu.memory_space<vmem>>, vector<1x2x48xf32>
    %554 = vector.shape_cast %553 : vector<1x2x48xf32> to vector<2x48xf32>
    %555 = tpu.concatenate %552, %554 in 0 : vector<2x48xf32>, vector<2x48xf32> -> vector<4x48xf32>
    %556 = vector.extract_strided_slice %555 {offsets = [0, 0], sizes = [4, 32], strides = [1, 1]} : vector<4x48xf32> to vector<4x32xf32>
    %557 = arith.addf %556, %527 : vector<4x32xf32>
    %558 = arith.negf %557 : vector<4x32xf32>
    %559 = math.exp %558 : vector<4x32xf32>
    %cst_197 = arith.constant 1.000000e+00 : f32
    %560 = vector.broadcast %cst_197 : f32 to vector<4x32xf32>
    %561 = arith.addf %560, %559 : vector<4x32xf32>
    %562 = arith.divf %560, %561 : vector<4x32xf32>
    %563 = vector.extract_strided_slice %562 {offsets = [0, 0], sizes = [4, 16], strides = [1, 1]} : vector<4x32xf32> to vector<4x16xf32>
    %564 = vector.extract_strided_slice %562 {offsets = [0, 16], sizes = [4, 16], strides = [1, 1]} : vector<4x32xf32> to vector<4x16xf32>
    %565 = vector.extract_strided_slice %555 {offsets = [0, 32], sizes = [4, 16], strides = [1, 1]} : vector<4x48xf32> to vector<4x16xf32>
    %566 = arith.mulf %563, %550 : vector<4x16xf32>
    %567 = arith.addf %565, %566 : vector<4x16xf32>
    %568 = math.tanh %567 : vector<4x16xf32>
    %cst_198 = arith.constant 1.000000e+00 : f32
    %569 = vector.broadcast %cst_198 : f32 to vector<4x16xf32>
    %570 = arith.subf %569, %564 : vector<4x16xf32>
    %571 = arith.mulf %570, %568 : vector<4x16xf32>
    %572 = arith.mulf %564, %501 : vector<4x16xf32>
    %573 = arith.addf %571, %572 : vector<4x16xf32>
    %c0_199 = arith.constant 0 : index
    %c0_200 = arith.constant 0 : index
    %574 = vector.load %arg11[%c0_199, %c0_200] : memref<4x16xf32, #tpu.memory_space<vmem>>, vector<4x16xf32>
    tpu.vector_store %arg11[%c0_199, %c0_200], %573 {strides = array<i32>} : memref<4x16xf32, #tpu.memory_space<vmem>>, vector<4x16xf32>,
    %575 = vector.extract_strided_slice %573 {offsets = [0, 0], sizes = [2, 16], strides = [1, 1]} : vector<4x16xf32> to vector<2x16xf32>
    %c6_201 = arith.constant 6 : index
    %c0_202 = arith.constant 0 : index
    %c0_203 = arith.constant 0 : index
    %576 = vector.load %arg9[%c6_201, %c0_202, %c0_203] : memref<8x2x16xf32, #tpu.memory_space<vmem>>, vector<1x2x16xf32>
    %577 = vector.shape_cast %576 : vector<1x2x16xf32> to vector<2x16xf32>
    %578 = vector.shape_cast %575 : vector<2x16xf32> to vector<1x2x16xf32>
    tpu.vector_store %arg9[%c6_201, %c0_202, %c0_203], %578 {strides = array<i32>} : memref<8x2x16xf32, #tpu.memory_space<vmem>>, vector<1x2x16xf32>,
    %579 = vector.extract_strided_slice %573 {offsets = [2, 0], sizes = [2, 16], strides = [1, 1]} : vector<4x16xf32> to vector<2x16xf32>
    %c1_204 = arith.constant 1 : index
    %c0_205 = arith.constant 0 : index
    %c0_206 = arith.constant 0 : index
    %580 = vector.load %arg10[%c1_204, %c0_205, %c0_206] : memref<8x2x16xf32, #tpu.memory_space<vmem>>, vector<1x2x16xf32>
    %581 = vector.shape_cast %580 : vector<1x2x16xf32> to vector<2x16xf32>
    %582 = vector.shape_cast %579 : vector<2x16xf32> to vector<1x2x16xf32>
    tpu.vector_store %arg10[%c1_204, %c0_205, %c0_206], %582 {strides = array<i32>} : memref<8x2x16xf32, #tpu.memory_space<vmem>>, vector<1x2x16xf32>,
    %c0_207 = arith.constant 0 : index
    %c0_208 = arith.constant 0 : index
    %583 = vector.load %arg11[%c0_207, %c0_208] : memref<4x16xf32, #tpu.memory_space<vmem>>, vector<4x16xf32>
    %cst_209 = arith.constant dense<0.000000e+00> : vector<4x48xf32>
    %584 = tpu.matmul %583, %3, %cst_209 {dimension_numbers = #tpu.dot_dimension_numbers<[1], [0], [0], [1], [0, 0, 1, 1], [], []>} : vector<4x16xf32>, vector<16x48xf32>, vector<4x48xf32> -> vector<4x48xf32>
    %585 = vector.broadcast %4 : vector<1x48xf32> to vector<4x48xf32>
    %586 = arith.addf %584, %585 : vector<4x48xf32>
    %587 = vector.extract_strided_slice %586 {offsets = [0, 0], sizes = [4, 32], strides = [1, 1]} : vector<4x48xf32> to vector<4x32xf32>
    %cst_210 = arith.constant dense<0.000000e+00> : vector<4xf32>
    %588 = vector.multi_reduction <add>, %587, %cst_210 [1] : vector<4x32xf32> to vector<4xf32>
    %589 = vector.shape_cast %588 : vector<4xf32> to vector<4x1xf32>
    %cst_211 = arith.constant 3.200000e+01 : f32
    %590 = vector.broadcast %cst_211 : f32 to vector<4x1xf32>
    %591 = arith.divf %589, %590 : vector<4x1xf32>
    %592 = arith.mulf %587, %587 : vector<4x32xf32>
    %cst_212 = arith.constant dense<0.000000e+00> : vector<4xf32>
    %593 = vector.multi_reduction <add>, %592, %cst_212 [1] : vector<4x32xf32> to vector<4xf32>
    %594 = vector.shape_cast %593 : vector<4xf32> to vector<4x1xf32>
    %cst_213 = arith.constant 3.200000e+01 : f32
    %595 = vector.broadcast %cst_213 : f32 to vector<4x1xf32>
    %596 = arith.divf %594, %595 : vector<4x1xf32>
    %597 = arith.mulf %591, %591 : vector<4x1xf32>
    %598 = arith.subf %596, %597 : vector<4x1xf32>
    %599 = vector.broadcast %591 : vector<4x1xf32> to vector<4x32xf32>
    %600 = arith.subf %587, %599 : vector<4x32xf32>
    %cst_214 = arith.constant 9.99999974E-6 : f32
    %601 = vector.broadcast %cst_214 : f32 to vector<4x1xf32>
    %602 = arith.addf %598, %601 : vector<4x1xf32>
    %603 = math.rsqrt %602 : vector<4x1xf32>
    %604 = vector.broadcast %603 : vector<4x1xf32> to vector<4x32xf32>
    %605 = arith.mulf %600, %604 : vector<4x32xf32>
    %606 = vector.broadcast %5 : vector<1x32xf32> to vector<4x32xf32>
    %607 = arith.mulf %605, %606 : vector<4x32xf32>
    %608 = vector.broadcast %6 : vector<1x32xf32> to vector<4x32xf32>
    %609 = arith.addf %607, %608 : vector<4x32xf32>
    %610 = vector.extract_strided_slice %586 {offsets = [0, 32], sizes = [4, 16], strides = [1, 1]} : vector<4x48xf32> to vector<4x16xf32>
    %cst_215 = arith.constant dense<0.000000e+00> : vector<4xf32>
    %611 = vector.multi_reduction <add>, %610, %cst_215 [1] : vector<4x16xf32> to vector<4xf32>
    %612 = vector.shape_cast %611 : vector<4xf32> to vector<4x1xf32>
    %cst_216 = arith.constant 1.600000e+01 : f32
    %613 = vector.broadcast %cst_216 : f32 to vector<4x1xf32>
    %614 = arith.divf %612, %613 : vector<4x1xf32>
    %615 = arith.mulf %610, %610 : vector<4x16xf32>
    %cst_217 = arith.constant dense<0.000000e+00> : vector<4xf32>
    %616 = vector.multi_reduction <add>, %615, %cst_217 [1] : vector<4x16xf32> to vector<4xf32>
    %617 = vector.shape_cast %616 : vector<4xf32> to vector<4x1xf32>
    %cst_218 = arith.constant 1.600000e+01 : f32
    %618 = vector.broadcast %cst_218 : f32 to vector<4x1xf32>
    %619 = arith.divf %617, %618 : vector<4x1xf32>
    %620 = arith.mulf %614, %614 : vector<4x1xf32>
    %621 = arith.subf %619, %620 : vector<4x1xf32>
    %622 = vector.broadcast %614 : vector<4x1xf32> to vector<4x16xf32>
    %623 = arith.subf %610, %622 : vector<4x16xf32>
    %cst_219 = arith.constant 9.99999974E-6 : f32
    %624 = vector.broadcast %cst_219 : f32 to vector<4x1xf32>
    %625 = arith.addf %621, %624 : vector<4x1xf32>
    %626 = math.rsqrt %625 : vector<4x1xf32>
    %627 = vector.broadcast %626 : vector<4x1xf32> to vector<4x16xf32>
    %628 = arith.mulf %623, %627 : vector<4x16xf32>
    %629 = vector.broadcast %7 : vector<1x16xf32> to vector<4x16xf32>
    %630 = arith.mulf %628, %629 : vector<4x16xf32>
    %631 = vector.broadcast %8 : vector<1x16xf32> to vector<4x16xf32>
    %632 = arith.addf %630, %631 : vector<4x16xf32>
    %c7_220 = arith.constant 7 : index
    %c0_221 = arith.constant 0 : index
    %c0_222 = arith.constant 0 : index
    %633 = vector.load %arg1[%c7_220, %c0_221, %c0_222] : memref<8x2x48xf32, #tpu.memory_space<vmem>>, vector<1x2x48xf32>
    %634 = vector.shape_cast %633 : vector<1x2x48xf32> to vector<2x48xf32>
    %c0_223 = arith.constant 0 : index
    %c0_224 = arith.constant 0 : index
    %c0_225 = arith.constant 0 : index
    %635 = vector.load %arg2[%c0_223, %c0_224, %c0_225] : memref<8x2x48xf32, #tpu.memory_space<vmem>>, vector<1x2x48xf32>
    %636 = vector.shape_cast %635 : vector<1x2x48xf32> to vector<2x48xf32>
    %637 = tpu.concatenate %634, %636 in 0 : vector<2x48xf32>, vector<2x48xf32> -> vector<4x48xf32>
    %638 = vector.extract_strided_slice %637 {offsets = [0, 0], sizes = [4, 32], strides = [1, 1]} : vector<4x48xf32> to vector<4x32xf32>
    %639 = arith.addf %638, %609 : vector<4x32xf32>
    %640 = arith.negf %639 : vector<4x32xf32>
    %641 = math.exp %640 : vector<4x32xf32>
    %cst_226 = arith.constant 1.000000e+00 : f32
    %642 = vector.broadcast %cst_226 : f32 to vector<4x32xf32>
    %643 = arith.addf %642, %641 : vector<4x32xf32>
    %644 = arith.divf %642, %643 : vector<4x32xf32>
    %645 = vector.extract_strided_slice %644 {offsets = [0, 0], sizes = [4, 16], strides = [1, 1]} : vector<4x32xf32> to vector<4x16xf32>
    %646 = vector.extract_strided_slice %644 {offsets = [0, 16], sizes = [4, 16], strides = [1, 1]} : vector<4x32xf32> to vector<4x16xf32>
    %647 = vector.extract_strided_slice %637 {offsets = [0, 32], sizes = [4, 16], strides = [1, 1]} : vector<4x48xf32> to vector<4x16xf32>
    %648 = arith.mulf %645, %632 : vector<4x16xf32>
    %649 = arith.addf %647, %648 : vector<4x16xf32>
    %650 = math.tanh %649 : vector<4x16xf32>
    %cst_227 = arith.constant 1.000000e+00 : f32
    %651 = vector.broadcast %cst_227 : f32 to vector<4x16xf32>
    %652 = arith.subf %651, %646 : vector<4x16xf32>
    %653 = arith.mulf %652, %650 : vector<4x16xf32>
    %654 = arith.mulf %646, %583 : vector<4x16xf32>
    %655 = arith.addf %653, %654 : vector<4x16xf32>
    %c0_228 = arith.constant 0 : index
    %c0_229 = arith.constant 0 : index
    %656 = vector.load %arg11[%c0_228, %c0_229] : memref<4x16xf32, #tpu.memory_space<vmem>>, vector<4x16xf32>
    tpu.vector_store %arg11[%c0_228, %c0_229], %655 {strides = array<i32>} : memref<4x16xf32, #tpu.memory_space<vmem>>, vector<4x16xf32>,
    %657 = vector.extract_strided_slice %655 {offsets = [0, 0], sizes = [2, 16], strides = [1, 1]} : vector<4x16xf32> to vector<2x16xf32>
    %c7_230 = arith.constant 7 : index
    %c0_231 = arith.constant 0 : index
    %c0_232 = arith.constant 0 : index
    %658 = vector.load %arg9[%c7_230, %c0_231, %c0_232] : memref<8x2x16xf32, #tpu.memory_space<vmem>>, vector<1x2x16xf32>
    %659 = vector.shape_cast %658 : vector<1x2x16xf32> to vector<2x16xf32>
    %660 = vector.shape_cast %657 : vector<2x16xf32> to vector<1x2x16xf32>
    tpu.vector_store %arg9[%c7_230, %c0_231, %c0_232], %660 {strides = array<i32>} : memref<8x2x16xf32, #tpu.memory_space<vmem>>, vector<1x2x16xf32>,
    %661 = vector.extract_strided_slice %655 {offsets = [2, 0], sizes = [2, 16], strides = [1, 1]} : vector<4x16xf32> to vector<2x16xf32>
    %c0_233 = arith.constant 0 : index
    %c0_234 = arith.constant 0 : index
    %c0_235 = arith.constant 0 : index
    %662 = vector.load %arg10[%c0_233, %c0_234, %c0_235] : memref<8x2x16xf32, #tpu.memory_space<vmem>>, vector<1x2x16xf32>
    %663 = vector.shape_cast %662 : vector<1x2x16xf32> to vector<2x16xf32>
    %664 = vector.shape_cast %661 : vector<2x16xf32> to vector<1x2x16xf32>
    tpu.vector_store %arg10[%c0_233, %c0_234, %c0_235], %664 {strides = array<i32>} : memref<8x2x16xf32, #tpu.memory_space<vmem>>, vector<1x2x16xf32>,
    return
  }
  func.func @transform_0(%arg0: i32) -> (i32, i32, i32) {
    %c0_i32 = arith.constant 0 : i32
    %c0_i32_0 = arith.constant 0 : i32
    %c0_i32_1 = arith.constant 0 : i32
    return %arg0, %c0_i32, %c0_i32_0 : i32, i32, i32
  }
  func.func @transform_1(%arg0: i32) -> (i32, i32, i32) {
    %c0_i32 = arith.constant 0 : i32
    %0 = arith.subi %c0_i32, %arg0 : i32
    %c0_i32_0 = arith.constant 0 : i32
    %c0_i32_1 = arith.constant 0 : i32
    %c0_i32_2 = arith.constant 0 : i32
    return %0, %c0_i32_0, %c0_i32_1 : i32, i32, i32
  }
  func.func @transform_2(%arg0: i32) -> (i32, i32) {
    %c0_i32 = arith.constant 0 : i32
    %c0_i32_0 = arith.constant 0 : i32
    %c0_i32_1 = arith.constant 0 : i32
    return %c0_i32, %c0_i32_0 : i32, i32
  }
  func.func @transform_3(%arg0: i32) -> (i32, i32) {
    %c0_i32 = arith.constant 0 : i32
    %c0_i32_0 = arith.constant 0 : i32
    %c0_i32_1 = arith.constant 0 : i32
    return %c0_i32, %c0_i32_0 : i32, i32
  }
  func.func @transform_4(%arg0: i32) -> (i32, i32) {
    %c0_i32 = arith.constant 0 : i32
    %c0_i32_0 = arith.constant 0 : i32
    %c0_i32_1 = arith.constant 0 : i32
    return %c0_i32, %c0_i32_0 : i32, i32
  }
  func.func @transform_5(%arg0: i32) -> (i32, i32) {
    %c0_i32 = arith.constant 0 : i32
    %c0_i32_0 = arith.constant 0 : i32
    %c0_i32_1 = arith.constant 0 : i32
    return %c0_i32, %c0_i32_0 : i32, i32
  }
  func.func @transform_6(%arg0: i32) -> (i32, i32) {
    %c0_i32 = arith.constant 0 : i32
    %c0_i32_0 = arith.constant 0 : i32
    %c0_i32_1 = arith.constant 0 : i32
    return %c0_i32, %c0_i32_0 : i32, i32
  }
  func.func @transform_7(%arg0: i32) -> (i32, i32) {
    %c0_i32 = arith.constant 0 : i32
    %c0_i32_0 = arith.constant 0 : i32
    %c0_i32_1 = arith.constant 0 : i32
    return %c0_i32, %c0_i32_0 : i32, i32
  }
  func.func @transform_8(%arg0: i32) -> (i32, i32, i32) {
    %c0_i32 = arith.constant 0 : i32
    %c0_i32_0 = arith.constant 0 : i32
    %c0_i32_1 = arith.constant 0 : i32
    return %arg0, %c0_i32, %c0_i32_0 : i32, i32, i32
  }
  func.func @transform_9(%arg0: i32) -> (i32, i32, i32) {
    %c0_i32 = arith.constant 0 : i32
    %0 = arith.subi %c0_i32, %arg0 : i32
    %c0_i32_0 = arith.constant 0 : i32
    %c0_i32_1 = arith.constant 0 : i32
    %c0_i32_2 = arith.constant 0 : i32
    return %0, %c0_i32_0, %c0_i32_1 : i32, i32, i32
  }
}

</mosaic_0001>

<bundles_post_ra>
// kernel: tpu_custom_call.1
= control target key start
LH: loop header
LB: loop body
LE: loop exit
PB: predicated region body
PF: predicated region fallthrough
CT: control target
= control target key end

     0   :  { %15 = vsyncpa [#allocation4], 0  ;;  %s2208_s0 = inlined_call_operand.hbm [shape: f32[8,2,48], index: 0, kind: input, shape index: {}]   ;;  %s2209_s1 = inlined_call_operand.hbm [shape: f32[8,2,48], index: 1, kind: input, shape index: {}]   ;;  %s2210_s2 = inlined_call_operand.hbm [shape: f32[16,48], index: 2, kind: input, shape index: {}]   ;;  %s2211_s3 = inlined_call_operand.vmem [shape: f32[1,48], index: 3, kind: input, shape index: {}]   ;;  %s2212_s4 = inlined_call_operand.vmem [shape: f32[1,32], index: 4, kind: input, shape index: {}]   ;;  %s2213_s5 = inlined_call_operand.vmem [shape: f32[1,32], index: 5, kind: input, shape index: {}]   ;;  %s2214_s6 = inlined_call_operand.vmem [shape: f32[1,16], index: 6, kind: input, shape index: {}]   ;;  %s2215_s7 = inlined_call_operand.vmem [shape: f32[1,16], index: 7, kind: input, shape index: {}]   ;;  %s2216_s8 = inlined_call_operand.hbm [shape: f32[8,2,16], index: 8, kind: output, shape index: {0}]   ;;  %s2217_s9 = inlined_call_operand.hbm [shape: f32[8,2,16], index: 9, kind: output, shape index: {1}]  }
   0x1   :  { %16 = vsyncpa [#allocation7], 0 }
   0x2   :  { %17 = vsyncpa [#allocation5], 0 }
   0x3   :  { %18 = vsyncpa [#allocation11], 0  ;;  %s1804_s30 = smov [#allocation6]   ;;  %s1805_s11 = smov [#allocation3]  }
   0x4   :  { %s40_s10 = sshll.u32 %s1804_s30, 4  ;;  %s24_s12 = sshll.u32 %s1805_s11, 4  ;;  %s41_s10 = int_to_ptr.vmem [resolvable:$true] %s40_s10  ;;  %s1869_s12 = int_to_ptr.vmem [resolvable:$true] %s24_s12 }
   0x5   :  { %s1686_s15 = scalar_lea.hbm %s2209_s1, 256 }
   0x6   :  { %p1687_p0 = scmp.ne.s32.totalorder %s2209_s1, %s1686_s15  ;;  %p1690_p1 = scmp.lt.u32.totalorder %s1686_s15, %s2209_s1 }
   0x8   :  { %p1692_p2 = pnand %p1690_p1, %p1687_p0 }
   0xa   :  { %1695 = shalt.err (!%p1692_p2)
}
   0xb   :  { %s1696_s20 = scalar_lea.vmem %s41_s10, 256  ;;  %p1701_p4 = scmp.lt.s32.totalorder %s41_s10, %s41_s10 }
   0xc   :  { %p1697_p3 = scmp.ne.s32.totalorder %s41_s10, %s1696_s20  ;;  %p1702_p5 = scmp.lt.s32.totalorder %s1696_s20, %s1696_s20 }
   0xe   :  { %p1703_p6 = por %p1702_p5, %p1701_p4 }
  0x10   :  { %p1704_p7 = pnand %p1703_p6, %p1697_p3 }
  0x12   :  { %1707 = shalt.err (!%p1704_p7)
}
  0x13   :  { %s1806_s21 = smov 32   ;;  %s1807_s22 = smov 2  }
  0x14   :  { %46 = dma.hbm_to_vmem [thread:$0]  %s2209_s1, 256, %s41_s10, [#allocation7], %s1806_s21, %s1806_s21, %s1807_s22  }
  0x15   :  { %s1708_s27 = scalar_lea.hbm %s2208_s0, 256 }
  0x16   :  { %p1709_p8 = scmp.ne.s32.totalorder %s2208_s0, %s1708_s27  ;;  %p1712_p9 = scmp.lt.u32.totalorder %s1708_s27, %s2208_s0 }
  0x18   :  { %p1714_p10 = pnand %p1712_p9, %p1709_p8 }
  0x1a   :  { %1717 = shalt.err (!%p1714_p10)
}
  0x1b   :  { %s1718_s13 = scalar_lea.vmem %s1869_s12, 256  ;;  %p1723_p12 = scmp.lt.s32.totalorder %s1869_s12, %s1869_s12 }
  0x1c   :  { %p1719_p11 = scmp.ne.s32.totalorder %s1869_s12, %s1718_s13  ;;  %p1724_p13 = scmp.lt.s32.totalorder %s1718_s13, %s1718_s13 }
  0x1e   :  { %p1725_p0 = por %p1724_p13, %p1723_p12 }
  0x20   :  { %p1726_p1 = pnand %p1725_p0, %p1719_p11 }
  0x22   :  { %1729 = shalt.err (!%p1726_p1)
}
  0x23   :  { %30 = dma.hbm_to_vmem [thread:$0]  %s2208_s0, 256, %s1869_s12, [#allocation4], %s1806_s21, %s1806_s21, %s1807_s22  }
  0x24   :  { %s1808_s14 = smov [#allocation8]   ;;  %s1730_s18 = scalar_lea.hbm %s2210_s2, 256 }
  0x25   :  { %s52_s15 = sshll.u32 %s1808_s14, 4  ;;  %p1731_p2 = scmp.ne.s32.totalorder %s2210_s2, %s1730_s18  ;;  %s53_s15 = int_to_ptr.vmem [resolvable:$true] %s52_s15 }
  0x26   :  { %p1734_p3 = scmp.lt.u32.totalorder %s1730_s18, %s2210_s2 }
  0x28   :  { %p1736_p4 = pnand %p1734_p3, %p1731_p2 }
  0x2a   :  { %1739 = shalt.err (!%p1736_p4)
}
  0x2b   :  { %s1740_s25 = scalar_lea.vmem %s53_s15, 256  ;;  %p1745_p6 = scmp.lt.s32.totalorder %s53_s15, %s53_s15 }
  0x2c   :  { %p1741_p5 = scmp.ne.s32.totalorder %s53_s15, %s1740_s25  ;;  %p1746_p7 = scmp.lt.s32.totalorder %s1740_s25, %s1740_s25 }
  0x2e   :  { %p1747_p8 = por %p1746_p7, %p1745_p6 }
  0x30   :  { %p1748_p9 = pnand %p1747_p8, %p1741_p5 }
  0x32   :  { %1751 = shalt.err (!%p1748_p9)
}
  0x33   :  { %s1809_s0 = smov 128   ;;  %s1810_s12 = smov 8  }
  0x34   :  { %58 = dma.hbm_to_vmem [thread:$0]  %s2210_s2, 256, %s53_s15, [#allocation7], %s1809_s0, %s1809_s0, %s1810_s12  }
  0x35   :  { %1796 = dma.done.wait [#allocation4], 256  }
  0x36   :  { %1797 = vsyncadd [#allocation4], 4294967040 }
  0x37   :  { %1798 = dma.done.wait [#allocation7], 512  }
  0x38   :  { %1799 = vsyncadd [#allocation7], 4294966784  ;;  %vm86_vm0 = vcmask 125952   ;;  %v1811_v0 = vmov 0.0|0.0   ;;  %v1812_v1 = vmov 0.0   ;;  %vm1813_vm1 = vmmov 0  }
  0x39   :  { %1564 = vmatprep.subr.bf16.mxu0 %v1811_v0  ;;  %87 = vst.msk [vmem:[#allocation2] sm:$0xf] %vm86_vm0, %v1812_v1  ;;  %1512 = vmatprep.mubr.msk.f32.mxu0 %vm1813_vm1, %v1812_v1  ;;  %v88_v2 = vld [vmem:[#allocation8] sm:$0xff]  ;;  %v89_v3 = vld [vmem:[#allocation8 + $0x8] sm:$0xff]  ;;  %v1467_v4 = vld [vmem:[%s2214_s6] ss:$0 sm:$0xff] }
  0x3a   :  { %1567 = vmatprep.subr.bf16.mxu1 %v1811_v0  ;;  %1519 = vmatprep.mubr.msk.f32.mxu1 %vm1813_vm1, %v1812_v1  ;;  %v1929_v5 = vpack.c.bf16 %v89_v3, %v88_v2  ;;  %vm102_vm2 = vcmask 130048   ;;  %v1947_v7 = vld [vmem:[%s2211_s3] ss:$0 sm:$0xff]  ;;  %s1814_s30 = smov 96   ;;  %vm176_vm3 = vcmask 257024   ;;  %vm255_vm4 = vcmask 1041408  }
  0x3b   :  { %236 = vrot.lane.b32.xlu1 %v1467_v4, %s1806_s21  ;;  %v1468_v18 = vld [vmem:[%s2215_s7] ss:$0 sm:$0xff]  ;;  %v251_v44 = vld [vmem:[#allocation6 + $0xe] sm:$0x3]  ;;  %v249_v48 = vld [vmem:[#allocation3] sm:$0x3] }
  0x3c   :  { %1566 = vmatpush3.bf16.msra.mxu0 %v1929_v5  ;;  %1569 = vmatpush3.bf16.msra.mxu1 %v1929_v5  ;;  %v1970_v43 = vld [vmem:[%s2212_s4] ss:$0 sm:$0xff]  ;;  %v253_v47 = vrot.slane %v251_v44, 6  ;;  %s1815_s15 = smov 16   ;;  %s1816_s16 = smov 112   ;;  %vm291_vm5 = vcmask 123904  }
  0x3d   :  { %1570 = vmatprep.subr.bf16.mxu0 %v1811_v0  ;;  %1573 = vmatprep.subr.bf16.mxu1 %v1811_v0  ;;  %v1976_v46 = vld [vmem:[%s2213_s5] ss:$0 sm:$0xff]  ;;  %vm294_vm6 = vcmask 125954   ;;  %s1818_s24 = smov [#allocation10]  }
  0x3e   :  { %v256_v50 = vsel %vm255_vm4, %v249_v48, %v253_v47  ;;  %v414_v44 = vld [vmem:[#allocation6 + $0xc] sm:$0x3]  ;;  %v412_v48 = vld [vmem:[#allocation3 + $0x2] sm:$0x3]  ;;  %s1442_s25 = sshll.u32 %s1818_s24, 4  ;;  %s2168_s25 = int_to_ptr.vmem [resolvable:$true] %s1442_s25 }
  0x3f   :  { %v416_v47 = vrot.slane %v414_v44, 6  ;;  %v575_v44 = vld [vmem:[#allocation6 + $0xa] sm:$0x3] }
  0x40   :  { %v1933_v6 = vld [vmem:[#allocation2] sm:$0xf] }
  0x41   :  { %1513 = vmatmul.mubr.msk.f32.vlgmr.msra.gmra.mrb[0].mxu0 %vm102_vm2, %v1933_v6 }
  0x42   :  { %1572 = vmatpush3.bf16.msra.mxu0 %v1929_v5  ;;  %1526 = vmatprep.mubr.msk.f32.mxu0 %vm1813_vm1, %v1812_v1 }
  0x43   :  { %1576 = vmatprep.subr.bf16.mxu0 %v1811_v0 }
  0xad   :  { %v1960_v19 = vpop.permute.xlu1 %236 }
 0x114   :  { %v172_v8 = vpop.f32.mrb[0].mxu0 }
 0x115   :  { %v173_v9 = vadd.f32 %v1947_v7, %v172_v8  ;;  %v1514_v10 = vpop.f32.mrb[1].mxu0 }
 0x117   :  { %208 = vrot.lane.b32.xlu0 %v173_v9, %s1814_s30  ;;  %v182_v11 = vmul.f32 %v173_v9, %v173_v9  ;;  %v177_v13 = vsel %vm176_vm3, %v173_v9, 0.0 }
 0x119   :  { %v183_v12 = vsel %vm176_vm3, %v182_v11, 0.0 }
 0x11a   :  { %184 = vadd.xlane.f32.xlu1 %v183_v12 }
 0x11b   :  { %218 = vrot.lane.b32.xlu0 %v182_v11, %s1814_s30 }
 0x13a   :  { %178 = vadd.xlane.f32.xlu0 %v177_v13 }
 0x189   :  { %v209_v14 = vpop.permute.xlu0 %208 }
 0x18a   :  { %v212_v15 = vsel %vm86_vm0, %v209_v14, 0.0 }
 0x18b   :  { %213 = vadd.xlane.f32.xlu1 %v212_v15 }
 0x18d   :  { %v219_v16 = vpop.permute.xlu0 %218 }
 0x18e   :  { %v221_v17 = vsel %vm86_vm0, %v219_v16, 0.0 }
 0x18f   :  { %222 = vadd.xlane.f32.xlu1 %v221_v17 }
 0x1a0   :  { %245 = vrot.lane.b32.xlu1 %v1468_v18, %s1806_s21 }
 0x1a7   :  { %v185_v20 = vpop.xlane.xlu1 %184 }
 0x1a8   :  { %v186_v37 = vmul.f32 0.03125, %v185_v20 }
 0x1c7   :  { %v179_v34 = vpop.xlane.xlu0 %178 }
 0x1c8   :  { %v181_v35 = vmul.f32 0.03125, %v179_v34 }
 0x1ca   :  { %v187_v36 = vmul.f32 %v181_v35, %v181_v35  ;;  %v189_v41 = vsub.f32 %v173_v9, %v181_v35 }
 0x1cc   :  { %v188_v38 = vsub.f32 %v186_v37, %v187_v36 }
 0x1ce   :  { %v190_v39 = vadd.f32 1e-05, %v188_v38 }
 0x218   :  { %v214_v21 = vpop.xlane.xlu1 %213 }
 0x219   :  { %v216_v22 = vmul.f32 0.0625, %v214_v21 }
 0x21b   :  { %v225_v24 = vmul.f32 %v216_v22, %v216_v22  ;;  %v227_v28 = vsub.f32 %v173_v9, %v216_v22 }
 0x21c   :  { %v223_v23 = vpop.xlane.xlu1 %222 }
 0x21d   :  { %v224_v25 = vmul.f32 0.0625, %v223_v23 }
 0x21f   :  { %v226_v26 = vsub.f32 %v224_v25, %v225_v24 }
 0x220   :  { %v1962_v31 = vpop.permute.xlu1 %245 }
 0x221   :  { %v228_v27 = vadd.f32 1e-05, %v226_v26 }
 0x223   :  { %1603 = vrsqrt.f32 %v228_v27 }
 0x224   :  { %1605 = vrsqrt.f32 %v190_v39 }
 0x22d   :  { %v1604_v29 = vpop.eup %1603 }
 0x22e   :  { %v230_v30 = vmul.f32 %v1604_v29, %v227_v28  ;;  %v1606_v40 = vpop.eup %1605 }
 0x22f   :  { %v192_v42 = vmul.f32 %v1606_v40, %v189_v41 }
 0x230   :  { %v239_v32 = vmul.f32 %v1960_v19, %v230_v30 }
 0x231   :  { %v199_v45 = vmul.f32 %v1970_v43, %v192_v42 }
 0x232   :  { %v248_v33 = vadd.f32 %v1962_v31, %v239_v32 }
 0x233   :  { %v206_v49 = vadd.f32 %v1976_v46, %v199_v45 }
 0x234   :  { %265 = vrot.lane.b32.xlu1 %v248_v33, %s1814_s30 }
 0x235   :  { %v257_v51 = vadd.f32 %v256_v50, %v206_v49 }
 0x237   :  { %v1469_v52 = vmul.f32 -1.442695, %v257_v51 }
 0x239   :  { %1607 = vpow2.f32 %v1469_v52 }
 0x243   :  { %v1608_v53 = vpop.eup %1607 }
 0x244   :  { %v261_v54 = vadd.f32 1.0, %v1608_v53 }
 0x246   :  { %1609 = vrcp.f32 %v261_v54 }
 0x250   :  { %v1610_v55 = vpop.eup %1609 }
 0x251   :  { %v275_v62 = vsub.f32 1.0, %v1610_v55 }
 0x2a6   :  { %v266_v56 = vpop.permute.xlu1 %265 }
 0x2a7   :  { %v268_v57 = vmul.f32 %v1610_v55, %v266_v56 }
 0x2a9   :  { %270 = vrot.lane.b32.xlu1 %v268_v57, %s1806_s21 }
 0x2ad   :  { %281 = vrot.lane.b32.xlu1 %v1933_v6, %s1815_s15 }
 0x31b   :  { %v271_v58 = vpop.permute.xlu1 %270 }
 0x31c   :  { %v273_v59 = vadd.f32 %v271_v58, %v256_v50  ;;  %v418_v50 = vsel %vm255_vm4, %v412_v48, %v416_v47  ;;  %v577_v47 = vrot.slane %v575_v44, 6  ;;  %v573_v48 = vld [vmem:[#allocation3 + $0x4] sm:$0x3] }
 0x31e   :  { %1611 = vtanh.f32 %v273_v59 }
 0x31f   :  { %v282_v61 = vpop.permute.xlu1 %281 }
 0x320   :  { %v284_v2 = vmul.f32 %v1610_v55, %v282_v61 }
 0x328   :  { %v1612_v60 = vpop.eup %1611 }
 0x329   :  { %277 = vrot.lane.b32.xlu0 %v1612_v60, %s1816_s16 }
 0x39b   :  { %v278_v63 = vpop.permute.xlu0 %277 }
 0x39c   :  { %v280_v3 = vmul.f32 %v278_v63, %v275_v62 }
 0x39e   :  { %v285_v4 = vadd.f32 %v284_v2, %v280_v3 }
 0x3a0   :  { %287 = vrot.lane.b32.xlu1 %v285_v4, %s1816_s16 }
 0x412   :  { %v288_v8 = vpop.permute.xlu1 %287 }
 0x413   :  { %290 = vst.msk [vmem:[#allocation2] sm:$0xf] %vm86_vm0, %v288_v8 }
 0x414   :  { %292 = vst.msk [vmem:[#allocation9] sm:$0x3] %vm291_vm5, %v288_v8 }
 0x415   :  { %295 = vst.msk [vmem:[#allocation10 + $0xc] sm:$0xc] %vm294_vm6, %v288_v8 }
 0x41a   :  { %v296_v6 = vld [vmem:[#allocation2] sm:$0xf] }
 0x41b   :  { %1520 = vmatmul.mubr.msk.f32.vlgmr.msra.gmra.mrb[0].mxu1 %vm102_vm2, %v296_v6 }
 0x41c   :  { %1575 = vmatpush3.bf16.msra.mxu1 %v1929_v5  ;;  %1533 = vmatprep.mubr.msk.f32.mxu1 %vm1813_vm1, %v1812_v1 }
 0x41d   :  { %1579 = vmatprep.subr.bf16.mxu1 %v1811_v0 }
 0x4ee   :  { %v366_v9 = vpop.f32.mrb[0].mxu1 }
 0x4ef   :  { %v367_v10 = vadd.f32 %v1947_v7, %v366_v9  ;;  %v1521_v11 = vpop.f32.mrb[1].mxu1 }
 0x4f1   :  { %388 = vrot.lane.b32.xlu1 %v367_v10, %s1814_s30  ;;  %v374_v12 = vmul.f32 %v367_v10, %v367_v10  ;;  %v370_v18 = vsel %vm176_vm3, %v367_v10, 0.0 }
 0x4f3   :  { %v375_v17 = vsel %vm176_vm3, %v374_v12, 0.0 }
 0x4f5   :  { %396 = vrot.lane.b32.xlu1 %v374_v12, %s1814_s30 }
 0x563   :  { %v389_v13 = vpop.permute.xlu1 %388 }
 0x564   :  { %v391_v14 = vsel %vm86_vm0, %v389_v13, 0.0 }
 0x565   :  { %392 = vadd.xlane.f32.xlu1 %v391_v14 }
 0x567   :  { %v397_v15 = vpop.permute.xlu1 %396 }
 0x568   :  { %v399_v16 = vsel %vm86_vm0, %v397_v15, 0.0 }
 0x569   :  { %400 = vadd.xlane.f32.xlu0 %v399_v16  ;;  %376 = vadd.xlane.f32.xlu1 %v375_v17 }
 0x56d   :  { %371 = vadd.xlane.f32.xlu0 %v370_v18 }
 0x5f2   :  { %v393_v20 = vpop.xlane.xlu1 %392 }
 0x5f3   :  { %v394_v21 = vmul.f32 0.0625, %v393_v20 }
 0x5f5   :  { %v403_v23 = vmul.f32 %v394_v21, %v394_v21  ;;  %v405_v27 = vsub.f32 %v367_v10, %v394_v21 }
 0x5f6   :  { %v401_v22 = vpop.xlane.xlu0 %400  ;;  %v377_v35 = vpop.xlane.xlu1 %376 }
 0x5f7   :  { %v402_v24 = vmul.f32 0.0625, %v401_v22  ;;  %v378_v37 = vmul.f32 0.03125, %v377_v35 }
 0x5f9   :  { %v404_v25 = vsub.f32 %v402_v24, %v403_v23 }
 0x5fa   :  { %v372_v33 = vpop.xlane.xlu0 %371 }
 0x5fb   :  { %v406_v26 = vadd.f32 1e-05, %v404_v25  ;;  %v373_v34 = vmul.f32 0.03125, %v372_v33 }
 0x5fd   :  { %1613 = vrsqrt.f32 %v406_v26  ;;  %v379_v36 = vmul.f32 %v373_v34, %v373_v34  ;;  %v381_v41 = vsub.f32 %v367_v10, %v373_v34 }
 0x5ff   :  { %v380_v38 = vsub.f32 %v378_v37, %v379_v36 }
 0x601   :  { %v382_v39 = vadd.f32 1e-05, %v380_v38 }
 0x603   :  { %1615 = vrsqrt.f32 %v382_v39 }
 0x607   :  { %v1614_v28 = vpop.eup %1613 }
 0x608   :  { %v408_v29 = vmul.f32 %v1614_v28, %v405_v27 }
 0x60a   :  { %v409_v30 = vmul.f32 %v408_v29, %v1960_v19 }
 0x60c   :  { %v410_v32 = vadd.f32 %v409_v30, %v1962_v31 }
 0x60d   :  { %v1616_v40 = vpop.eup %1615 }
 0x60e   :  { %427 = vrot.lane.b32.xlu0 %v410_v32, %s1814_s30  ;;  %v384_v42 = vmul.f32 %v1616_v40, %v381_v41 }
 0x610   :  { %v385_v45 = vmul.f32 %v1970_v43, %v384_v42 }
 0x612   :  { %443 = vrot.lane.b32.xlu0 %v296_v6, %s1815_s15  ;;  %v386_v49 = vadd.f32 %v1976_v46, %v385_v45 }
 0x614   :  { %v419_v51 = vadd.f32 %v418_v50, %v386_v49 }
 0x616   :  { %v1471_v52 = vmul.f32 -1.442695, %v419_v51 }
 0x618   :  { %1617 = vpow2.f32 %v1471_v52 }
 0x622   :  { %v1618_v53 = vpop.eup %1617 }
 0x623   :  { %v423_v54 = vadd.f32 1.0, %v1618_v53 }
 0x625   :  { %1619 = vrcp.f32 %v423_v54 }
 0x62f   :  { %v1620_v55 = vpop.eup %1619 }
 0x630   :  { %v437_v62 = vsub.f32 1.0, %v1620_v55 }
 0x680   :  { %v428_v56 = vpop.permute.xlu0 %427 }
 0x681   :  { %v430_v57 = vmul.f32 %v1620_v55, %v428_v56 }
 0x683   :  { %432 = vrot.lane.b32.xlu1 %v430_v57, %s1806_s21 }
 0x684   :  { %v444_v61 = vpop.permute.xlu0 %443 }
 0x685   :  { %v446_v2 = vmul.f32 %v1620_v55, %v444_v61 }
 0x6f5   :  { %v433_v58 = vpop.permute.xlu1 %432 }
 0x6f6   :  { %v435_v59 = vadd.f32 %v433_v58, %v418_v50  ;;  %v579_v50 = vsel %vm255_vm4, %v573_v48, %v577_v47  ;;  %v734_v47 = vld [vmem:[#allocation3 + $0x6] sm:$0x3] }
 0x6f8   :  { %1621 = vtanh.f32 %v435_v59 }
 0x702   :  { %v1622_v60 = vpop.eup %1621 }
 0x703   :  { %439 = vrot.lane.b32.xlu1 %v1622_v60, %s1816_s16 }
 0x775   :  { %v440_v63 = vpop.permute.xlu1 %439 }
 0x776   :  { %v442_v3 = vmul.f32 %v440_v63, %v437_v62 }
 0x778   :  { %v447_v4 = vadd.f32 %v446_v2, %v442_v3 }
 0x77a   :  { %449 = vrot.lane.b32.xlu1 %v447_v4, %s1816_s16 }
 0x7ec   :  { %v450_v8 = vpop.permute.xlu1 %449 }
 0x7ed   :  { %452 = vst.msk [vmem:[#allocation2] sm:$0xf] %vm86_vm0, %v450_v8 }
 0x7ee   :  { %454 = vst.msk [vmem:[#allocation9 + $0x2] sm:$0x3] %vm291_vm5, %v450_v8 }
 0x7ef   :  { %456 = vst.msk [vmem:[#allocation10 + $0xa] sm:$0xc] %vm294_vm6, %v450_v8 }
 0x7f4   :  { %v2013_v6 = vld [vmem:[#allocation2] sm:$0xf] }
 0x7f5   :  { %1527 = vmatmul.mubr.msk.f32.vlgmr.msra.gmra.mrb[2].mxu0 %vm102_vm2, %v2013_v6 }
 0x7f6   :  { %1578 = vmatpush3.bf16.msra.mxu0 %v1929_v5  ;;  %1540 = vmatprep.mubr.msk.f32.mxu0 %vm1813_vm1, %v1812_v1 }
 0x7f7   :  { %1582 = vmatprep.subr.bf16.mxu0 %v1811_v0 }
 0x8c8   :  { %v527_v9 = vpop.f32.mrb[2].mxu0 }
 0x8c9   :  { %v528_v10 = vadd.f32 %v1947_v7, %v527_v9  ;;  %v1528_v11 = vpop.f32.mrb[3].mxu0 }
 0x8cb   :  { %549 = vrot.lane.b32.xlu0 %v528_v10, %s1814_s30  ;;  %v535_v12 = vmul.f32 %v528_v10, %v528_v10  ;;  %v531_v17 = vsel %vm176_vm3, %v528_v10, 0.0 }
 0x8cd   :  { %557 = vrot.lane.b32.xlu1 %v535_v12, %s1814_s30  ;;  %v536_v18 = vsel %vm176_vm3, %v535_v12, 0.0 }
 0x93d   :  { %v550_v13 = vpop.permute.xlu0 %549 }
 0x93e   :  { %v552_v14 = vsel %vm86_vm0, %v550_v13, 0.0 }
 0x93f   :  { %553 = vadd.xlane.f32.xlu0 %v552_v14  ;;  %v558_v15 = vpop.permute.xlu1 %557 }
 0x940   :  { %v560_v16 = vsel %vm86_vm0, %v558_v15, 0.0 }
 0x941   :  { %561 = vadd.xlane.f32.xlu1 %v560_v16 }
 0x943   :  { %532 = vadd.xlane.f32.xlu0 %v531_v17 }
 0x947   :  { %537 = vadd.xlane.f32.xlu0 %v536_v18 }
 0x9cc   :  { %v554_v20 = vpop.xlane.xlu0 %553 }
 0x9cd   :  { %v555_v21 = vmul.f32 0.0625, %v554_v20 }
 0x9ce   :  { %v562_v22 = vpop.xlane.xlu1 %561 }
 0x9cf   :  { %v564_v23 = vmul.f32 %v555_v21, %v555_v21  ;;  %v563_v24 = vmul.f32 0.0625, %v562_v22  ;;  %v566_v27 = vsub.f32 %v528_v10, %v555_v21 }
 0x9d0   :  { %v533_v33 = vpop.xlane.xlu0 %532 }
 0x9d1   :  { %v565_v25 = vsub.f32 %v563_v24, %v564_v23  ;;  %v534_v35 = vmul.f32 0.03125, %v533_v33 }
 0x9d3   :  { %v567_v26 = vadd.f32 1e-05, %v565_v25  ;;  %v540_v37 = vmul.f32 %v534_v35, %v534_v35  ;;  %v542_v41 = vsub.f32 %v528_v10, %v534_v35 }
 0x9d4   :  { %v538_v34 = vpop.xlane.xlu0 %537 }
 0x9d5   :  { %1623 = vrsqrt.f32 %v567_v26  ;;  %v539_v36 = vmul.f32 0.03125, %v538_v34 }
 0x9d7   :  { %v541_v38 = vsub.f32 %v539_v36, %v540_v37 }
 0x9d9   :  { %v543_v39 = vadd.f32 1e-05, %v541_v38 }
 0x9db   :  { %1625 = vrsqrt.f32 %v543_v39 }
 0x9df   :  { %v1624_v28 = vpop.eup %1623 }
 0x9e0   :  { %v569_v29 = vmul.f32 %v1624_v28, %v566_v27 }
 0x9e2   :  { %v570_v30 = vmul.f32 %v569_v29, %v1960_v19 }
 0x9e4   :  { %v571_v32 = vadd.f32 %v570_v30, %v1962_v31 }
 0x9e5   :  { %v1626_v40 = vpop.eup %1625 }
 0x9e6   :  { %588 = vrot.lane.b32.xlu1 %v571_v32, %s1814_s30  ;;  %v545_v42 = vmul.f32 %v1626_v40, %v542_v41 }
 0x9e8   :  { %v546_v45 = vmul.f32 %v1970_v43, %v545_v42  ;;  %v736_v42 = vld [vmem:[#allocation6 + $0x8] sm:$0x3] }
 0x9ea   :  { %v547_v49 = vadd.f32 %v1976_v46, %v546_v45  ;;  %v738_v45 = vrot.slane %v736_v42, 6 }
 0x9ec   :  { %v580_v51 = vadd.f32 %v579_v50, %v547_v49  ;;  %v740_v49 = vsel %vm255_vm4, %v734_v47, %v738_v45  ;;  %v895_v45 = vld [vmem:[#allocation3 + $0x8] sm:$0x3] }
 0x9ee   :  { %v1473_v52 = vmul.f32 -1.442695, %v580_v51 }
 0x9f0   :  { %1627 = vpow2.f32 %v1473_v52 }
 0x9fa   :  { %v1628_v53 = vpop.eup %1627 }
 0x9fb   :  { %v584_v54 = vadd.f32 1.0, %v1628_v53 }
 0x9fd   :  { %1629 = vrcp.f32 %v584_v54 }
 0xa07   :  { %v1630_v55 = vpop.eup %1629 }
 0xa08   :  { %v598_v62 = vsub.f32 1.0, %v1630_v55 }
 0xa58   :  { %v589_v56 = vpop.permute.xlu1 %588 }
 0xa59   :  { %v591_v57 = vmul.f32 %v1630_v55, %v589_v56 }
 0xa5b   :  { %593 = vrot.lane.b32.xlu0 %v591_v57, %s1806_s21 }
 0xacd   :  { %v594_v58 = vpop.permute.xlu0 %593 }
 0xace   :  { %v596_v59 = vadd.f32 %v594_v58, %v579_v50 }
 0xad0   :  { %1631 = vtanh.f32 %v596_v59 }
 0xada   :  { %v1632_v60 = vpop.eup %1631 }
 0xadb   :  { %600 = vrot.lane.b32.xlu1 %v1632_v60, %s1816_s16 }
 0xadf   :  { %604 = vrot.lane.b32.xlu1 %v2013_v6, %s1815_s15 }
 0xb4d   :  { %v601_v61 = vpop.permute.xlu1 %600 }
 0xb4e   :  { %v603_v2 = vmul.f32 %v601_v61, %v598_v62 }
 0xb51   :  { %v605_v63 = vpop.permute.xlu1 %604 }
 0xb52   :  { %v607_v3 = vmul.f32 %v1630_v55, %v605_v63 }
 0xb54   :  { %v608_v4 = vadd.f32 %v607_v3, %v603_v2 }
 0xb56   :  { %610 = vrot.lane.b32.xlu0 %v608_v4, %s1816_s16 }
 0xbc8   :  { %v611_v8 = vpop.permute.xlu0 %610 }
 0xbc9   :  { %613 = vst.msk [vmem:[#allocation2] sm:$0xf] %vm86_vm0, %v611_v8 }
 0xbca   :  { %615 = vst.msk [vmem:[#allocation9 + $0x4] sm:$0x3] %vm291_vm5, %v611_v8 }
 0xbcb   :  { %617 = vst.msk [vmem:[#allocation10 + $0x8] sm:$0xc] %vm294_vm6, %v611_v8 }
 0xbd0   :  { %v618_v9 = vld [vmem:[#allocation2] sm:$0xf] }
 0xbd1   :  { %1534 = vmatmul.mubr.msk.f32.vlgmr.msra.gmra.mrb[2].mxu1 %vm102_vm2, %v618_v9 }
 0xbd2   :  { %1581 = vmatpush3.bf16.msra.mxu1 %v1929_v5  ;;  %1547 = vmatprep.mubr.msk.f32.mxu1 %vm1813_vm1, %v1812_v1 }
 0xbd3   :  { %1585 = vmatprep.subr.bf16.mxu1 %v1811_v0 }
 0xca4   :  { %v688_v6 = vpop.f32.mrb[2].mxu1 }
 0xca5   :  { %v689_v10 = vadd.f32 %v1947_v7, %v688_v6  ;;  %v1535_v11 = vpop.f32.mrb[3].mxu1 }
 0xca7   :  { %710 = vrot.lane.b32.xlu1 %v689_v10, %s1814_s30  ;;  %v696_v12 = vmul.f32 %v689_v10, %v689_v10  ;;  %v692_v0 = vsel %vm176_vm3, %v689_v10, 0.0 }
 0xca9   :  { %718 = vrot.lane.b32.xlu0 %v696_v12, %s1814_s30  ;;  %v697_v17 = vsel %vm176_vm3, %v696_v12, 0.0 }
 0xd19   :  { %v711_v13 = vpop.permute.xlu1 %710 }
 0xd1a   :  { %v713_v14 = vsel %vm86_vm0, %v711_v13, 0.0 }
 0xd1b   :  { %714 = vadd.xlane.f32.xlu1 %v713_v14  ;;  %v719_v15 = vpop.permute.xlu0 %718 }
 0xd1c   :  { %v721_v16 = vsel %vm86_vm0, %v719_v15, 0.0 }
 0xd1d   :  { %722 = vadd.xlane.f32.xlu0 %v721_v16 }
 0xd1f   :  { %698 = vadd.xlane.f32.xlu1 %v697_v17 }
 0xd21   :  { %693 = vadd.xlane.f32.xlu0 %v692_v0 }
 0xda8   :  { %v715_v18 = vpop.xlane.xlu1 %714 }
 0xda9   :  { %v716_v20 = vmul.f32 0.0625, %v715_v18 }
 0xdaa   :  { %v723_v21 = vpop.xlane.xlu0 %722 }
 0xdab   :  { %v725_v22 = vmul.f32 %v716_v20, %v716_v20  ;;  %v724_v23 = vmul.f32 0.0625, %v723_v21  ;;  %v727_v26 = vsub.f32 %v689_v10, %v716_v20 }
 0xdac   :  { %v699_v34 = vpop.xlane.xlu1 %698 }
 0xdad   :  { %v726_v24 = vsub.f32 %v724_v23, %v725_v22  ;;  %v700_v36 = vmul.f32 0.03125, %v699_v34 }
 0xdae   :  { %v694_v32 = vpop.xlane.xlu0 %693 }
 0xdaf   :  { %v728_v25 = vadd.f32 1e-05, %v726_v24  ;;  %v695_v33 = vmul.f32 0.03125, %v694_v32 }
 0xdb1   :  { %1633 = vrsqrt.f32 %v728_v25  ;;  %v701_v35 = vmul.f32 %v695_v33, %v695_v33  ;;  %v703_v40 = vsub.f32 %v689_v10, %v695_v33 }
 0xdb3   :  { %v702_v37 = vsub.f32 %v700_v36, %v701_v35 }
 0xdb5   :  { %v704_v38 = vadd.f32 1e-05, %v702_v37 }
 0xdb7   :  { %1635 = vrsqrt.f32 %v704_v38 }
 0xdbb   :  { %v1634_v27 = vpop.eup %1633 }
 0xdbc   :  { %v730_v28 = vmul.f32 %v1634_v27, %v727_v26 }
 0xdbe   :  { %v731_v29 = vmul.f32 %v730_v28, %v1960_v19 }
 0xdc0   :  { %v732_v30 = vadd.f32 %v731_v29, %v1962_v31 }
 0xdc1   :  { %v1636_v39 = vpop.eup %1635 }
 0xdc2   :  { %749 = vrot.lane.b32.xlu0 %v732_v30, %s1814_s30  ;;  %v706_v41 = vmul.f32 %v1636_v39, %v703_v40 }
 0xdc4   :  { %v707_v44 = vmul.f32 %v1970_v43, %v706_v41  ;;  %v897_v41 = vld [vmem:[#allocation6 + $0x6] sm:$0x3] }
 0xdc6   :  { %765 = vrot.lane.b32.xlu0 %v618_v9, %s1815_s15  ;;  %v708_v48 = vadd.f32 %v1976_v46, %v707_v44  ;;  %v899_v44 = vrot.slane %v897_v41, 6  ;;  %v1056_v41 = vld [vmem:[#allocation3 + $0xa] sm:$0x3] }
 0xdc8   :  { %v741_v50 = vadd.f32 %v740_v49, %v708_v48  ;;  %v901_v48 = vsel %vm255_vm4, %v895_v45, %v899_v44 }
 0xdca   :  { %v1475_v51 = vmul.f32 -1.442695, %v741_v50 }
 0xdcc   :  { %1637 = vpow2.f32 %v1475_v51 }
 0xdd6   :  { %v1638_v52 = vpop.eup %1637 }
 0xdd7   :  { %v745_v53 = vadd.f32 1.0, %v1638_v52 }
 0xdd9   :  { %1639 = vrcp.f32 %v745_v53 }
 0xde3   :  { %v1640_v54 = vpop.eup %1639 }
 0xde4   :  { %v759_v61 = vsub.f32 1.0, %v1640_v54 }
 0xe34   :  { %v750_v55 = vpop.permute.xlu0 %749 }
 0xe35   :  { %v752_v56 = vmul.f32 %v1640_v54, %v750_v55 }
 0xe37   :  { %754 = vrot.lane.b32.xlu1 %v752_v56, %s1806_s21 }
 0xe38   :  { %v766_v60 = vpop.permute.xlu0 %765 }
 0xe39   :  { %v768_v63 = vmul.f32 %v1640_v54, %v766_v60 }
 0xea9   :  { %v755_v57 = vpop.permute.xlu1 %754 }
 0xeaa   :  { %v757_v58 = vadd.f32 %v755_v57, %v740_v49 }
 0xeac   :  { %1641 = vtanh.f32 %v757_v58 }
 0xeb6   :  { %v1642_v59 = vpop.eup %1641 }
 0xeb7   :  { %761 = vrot.lane.b32.xlu1 %v1642_v59, %s1816_s16 }
 0xf29   :  { %v762_v62 = vpop.permute.xlu1 %761 }
 0xf2a   :  { %v764_v2 = vmul.f32 %v762_v62, %v759_v61 }
 0xf2c   :  { %v769_v3 = vadd.f32 %v768_v63, %v764_v2 }
 0xf2e   :  { %771 = vrot.lane.b32.xlu1 %v769_v3, %s1816_s16 }
 0xfa0   :  { %v772_v4 = vpop.permute.xlu1 %771 }
 0xfa1   :  { %774 = vst.msk [vmem:[#allocation2] sm:$0xf] %vm86_vm0, %v772_v4 }
 0xfa2   :  { %776 = vst.msk [vmem:[#allocation9 + $0x6] sm:$0x3] %vm291_vm5, %v772_v4 }
 0xfa3   :  { %778 = vst.msk [vmem:[#allocation10 + $0x6] sm:$0xc] %vm294_vm6, %v772_v4 }
 0xfa8   :  { %v2067_v8 = vld [vmem:[#allocation2] sm:$0xf] }
 0xfa9   :  { %1541 = vmatmul.mubr.msk.f32.vlgmr.msra.gmra.mrb[4].mxu0 %vm102_vm2, %v2067_v8 }
 0xfaa   :  { %1584 = vmatpush3.bf16.msra.mxu0 %v1929_v5  ;;  %1554 = vmatprep.mubr.msk.f32.mxu0 %vm1813_vm1, %v1812_v1 }
0x107c   :  { %v849_v9 = vpop.f32.mrb[4].mxu0 }
0x107d   :  { %v850_v6 = vadd.f32 %v1947_v7, %v849_v9  ;;  %v1542_v10 = vpop.f32.mrb[5].mxu0 }
0x107f   :  { %871 = vrot.lane.b32.xlu0 %v850_v6, %s1814_s30  ;;  %v857_v11 = vmul.f32 %v850_v6, %v850_v6  ;;  %v853_v16 = vsel %vm176_vm3, %v850_v6, 0.0 }
0x1081   :  { %879 = vrot.lane.b32.xlu1 %v857_v11, %s1814_s30  ;;  %v858_v17 = vsel %vm176_vm3, %v857_v11, 0.0 }
0x10f1   :  { %v872_v12 = vpop.permute.xlu0 %871 }
0x10f2   :  { %v874_v13 = vsel %vm86_vm0, %v872_v12, 0.0 }
0x10f3   :  { %875 = vadd.xlane.f32.xlu0 %v874_v13  ;;  %v880_v14 = vpop.permute.xlu1 %879 }
0x10f4   :  { %v882_v15 = vsel %vm86_vm0, %v880_v14, 0.0 }
0x10f5   :  { %883 = vadd.xlane.f32.xlu1 %v882_v15 }
0x10f7   :  { %854 = vadd.xlane.f32.xlu0 %v853_v16 }
0x10fb   :  { %859 = vadd.xlane.f32.xlu0 %v858_v17 }
0x1180   :  { %v876_v0 = vpop.xlane.xlu0 %875 }
0x1181   :  { %v877_v18 = vmul.f32 0.0625, %v876_v0 }
0x1182   :  { %v884_v20 = vpop.xlane.xlu1 %883 }
0x1183   :  { %v886_v21 = vmul.f32 %v877_v18, %v877_v18  ;;  %v885_v22 = vmul.f32 0.0625, %v884_v20  ;;  %v888_v25 = vsub.f32 %v850_v6, %v877_v18 }
0x1184   :  { %v855_v30 = vpop.xlane.xlu0 %854 }
0x1185   :  { %v887_v23 = vsub.f32 %v885_v22, %v886_v21  ;;  %v856_v33 = vmul.f32 0.03125, %v855_v30 }
0x1187   :  { %v889_v24 = vadd.f32 1e-05, %v887_v23  ;;  %v862_v35 = vmul.f32 %v856_v33, %v856_v33  ;;  %v864_v39 = vsub.f32 %v850_v6, %v856_v33 }
0x1188   :  { %v860_v32 = vpop.xlane.xlu0 %859 }
0x1189   :  { %1643 = vrsqrt.f32 %v889_v24  ;;  %v861_v34 = vmul.f32 0.03125, %v860_v32 }
0x118b   :  { %v863_v36 = vsub.f32 %v861_v34, %v862_v35 }
0x118d   :  { %v865_v37 = vadd.f32 1e-05, %v863_v36 }
0x118f   :  { %1645 = vrsqrt.f32 %v865_v37 }
0x1193   :  { %v1644_v26 = vpop.eup %1643 }
0x1194   :  { %v891_v27 = vmul.f32 %v1644_v26, %v888_v25 }
0x1196   :  { %v892_v28 = vmul.f32 %v891_v27, %v1960_v19 }
0x1198   :  { %v893_v29 = vadd.f32 %v892_v28, %v1962_v31 }
0x1199   :  { %v1646_v38 = vpop.eup %1645 }
0x119a   :  { %910 = vrot.lane.b32.xlu1 %v893_v29, %s1814_s30  ;;  %v867_v40 = vmul.f32 %v1646_v38, %v864_v39  ;;  %v1058_v38 = vld [vmem:[#allocation6 + $0x4] sm:$0x3] }
0x119c   :  { %v868_v42 = vmul.f32 %v1970_v43, %v867_v40  ;;  %v1060_v40 = vrot.slane %v1058_v38, 6 }
0x119e   :  { %v869_v47 = vadd.f32 %v1976_v46, %v868_v42  ;;  %v1062_v44 = vsel %vm255_vm4, %v1056_v41, %v1060_v40 }
0x11a0   :  { %v902_v49 = vadd.f32 %v901_v48, %v869_v47 }
0x11a2   :  { %v1477_v50 = vmul.f32 -1.442695, %v902_v49 }
0x11a4   :  { %1647 = vpow2.f32 %v1477_v50 }
0x11ae   :  { %v1648_v51 = vpop.eup %1647 }
0x11af   :  { %v906_v52 = vadd.f32 1.0, %v1648_v51 }
0x11b1   :  { %1649 = vrcp.f32 %v906_v52 }
0x11bb   :  { %v1650_v53 = vpop.eup %1649 }
0x11bc   :  { %v920_v60 = vsub.f32 1.0, %v1650_v53 }
0x120c   :  { %v911_v54 = vpop.permute.xlu1 %910 }
0x120d   :  { %v913_v55 = vmul.f32 %v1650_v53, %v911_v54 }
0x120f   :  { %915 = vrot.lane.b32.xlu0 %v913_v55, %s1806_s21 }
0x1281   :  { %v916_v56 = vpop.permute.xlu0 %915 }
0x1282   :  { %v918_v57 = vadd.f32 %v916_v56, %v901_v48 }
0x1284   :  { %1651 = vtanh.f32 %v918_v57 }
0x128e   :  { %v1652_v58 = vpop.eup %1651 }
0x128f   :  { %922 = vrot.lane.b32.xlu1 %v1652_v58, %s1816_s16 }
0x1293   :  { %926 = vrot.lane.b32.xlu1 %v2067_v8, %s1815_s15 }
0x1301   :  { %v923_v59 = vpop.permute.xlu1 %922 }
0x1302   :  { %v925_v62 = vmul.f32 %v923_v59, %v920_v60 }
0x1305   :  { %v927_v61 = vpop.permute.xlu1 %926 }
0x1306   :  { %v929_v63 = vmul.f32 %v1650_v53, %v927_v61 }
0x1308   :  { %v930_v2 = vadd.f32 %v929_v63, %v925_v62 }
0x130a   :  { %932 = vrot.lane.b32.xlu0 %v930_v2, %s1816_s16 }
0x137c   :  { %v933_v3 = vpop.permute.xlu0 %932 }
0x137d   :  { %935 = vst.msk [vmem:[#allocation2] sm:$0xf] %vm86_vm0, %v933_v3 }
0x137e   :  { %937 = vst.msk [vmem:[#allocation9 + $0x8] sm:$0x3] %vm291_vm5, %v933_v3 }
0x137f   :  { %939 = vst.msk [vmem:[#allocation10 + $0x4] sm:$0xc] %vm294_vm6, %v933_v3 }
0x1384   :  { %v940_v4 = vld [vmem:[#allocation2] sm:$0xf] }
0x1385   :  { %1548 = vmatmul.mubr.msk.f32.vlgmr.msra.gmra.mrb[4].mxu1 %vm102_vm2, %v940_v4 }
0x1386   :  { %1587 = vmatpush3.bf16.msra.mxu1 %v1929_v5  ;;  %1561 = vmatprep.mubr.msk.f32.mxu1 %vm1813_vm1, %v1812_v1 }
0x1458   :  { %v1010_v8 = vpop.f32.mrb[4].mxu1 }
0x1459   :  { %v1011_v9 = vadd.f32 %v1947_v7, %v1010_v8  ;;  %v1549_v6 = vpop.f32.mrb[5].mxu1 }
0x145b   :  { %1032 = vrot.lane.b32.xlu1 %v1011_v9, %s1814_s30  ;;  %v1018_v10 = vmul.f32 %v1011_v9, %v1011_v9  ;;  %v1014_v1 = vsel %vm176_vm3, %v1011_v9, 0.0 }
0x145d   :  { %1040 = vrot.lane.b32.xlu0 %v1018_v10, %s1814_s30  ;;  %v1019_v5 = vsel %vm176_vm3, %v1018_v10, 0.0 }
0x14cd   :  { %v1033_v11 = vpop.permute.xlu1 %1032 }
0x14ce   :  { %v1035_v12 = vsel %vm86_vm0, %v1033_v11, 0.0 }
0x14cf   :  { %1036 = vadd.xlane.f32.xlu1 %v1035_v12  ;;  %v1041_v13 = vpop.permute.xlu0 %1040 }
0x14d0   :  { %v1043_v14 = vsel %vm86_vm0, %v1041_v13, 0.0 }
0x14d1   :  { %1044 = vadd.xlane.f32.xlu0 %v1043_v14 }
0x14d3   :  { %1020 = vadd.xlane.f32.xlu1 %v1019_v5 }
0x14d5   :  { %1015 = vadd.xlane.f32.xlu0 %v1014_v1 }
0x155c   :  { %v1037_v15 = vpop.xlane.xlu1 %1036 }
0x155d   :  { %v1038_v16 = vmul.f32 0.0625, %v1037_v15 }
0x155e   :  { %v1045_v17 = vpop.xlane.xlu0 %1044 }
0x155f   :  { %v1047_v0 = vmul.f32 %v1038_v16, %v1038_v16  ;;  %v1046_v18 = vmul.f32 0.0625, %v1045_v17  ;;  %v1049_v22 = vsub.f32 %v1011_v9, %v1038_v16 }
0x1560   :  { %v1021_v29 = vpop.xlane.xlu1 %1020 }
0x1561   :  { %v1048_v20 = vsub.f32 %v1046_v18, %v1047_v0  ;;  %v1022_v32 = vmul.f32 0.03125, %v1021_v29 }
0x1562   :  { %v1016_v27 = vpop.xlane.xlu0 %1015 }
0x1563   :  { %v1050_v21 = vadd.f32 1e-05, %v1048_v20  ;;  %v1017_v28 = vmul.f32 0.03125, %v1016_v27 }
0x1565   :  { %1653 = vrsqrt.f32 %v1050_v21  ;;  %v1023_v30 = vmul.f32 %v1017_v28, %v1017_v28  ;;  %v1025_v36 = vsub.f32 %v1011_v9, %v1017_v28 }
0x1567   :  { %v1024_v33 = vsub.f32 %v1022_v32, %v1023_v30 }
0x1569   :  { %v1026_v34 = vadd.f32 1e-05, %v1024_v33 }
0x156b   :  { %1655 = vrsqrt.f32 %v1026_v34  ;;  %v1219_v34 = vld [vmem:[#allocation6 + $0x2] sm:$0x3] }
0x156f   :  { %v1654_v23 = vpop.eup %1653 }
0x1570   :  { %v1052_v24 = vmul.f32 %v1654_v23, %v1049_v22 }
0x1572   :  { %v1053_v25 = vmul.f32 %v1052_v24, %v1960_v19 }
0x1574   :  { %v1054_v26 = vadd.f32 %v1053_v25, %v1962_v31 }
0x1575   :  { %v1656_v35 = vpop.eup %1655 }
0x1576   :  { %1071 = vrot.lane.b32.xlu0 %v1054_v26, %s1814_s30  ;;  %v1028_v37 = vmul.f32 %v1656_v35, %v1025_v36  ;;  %v1221_v36 = vrot.slane %v1219_v34, 6 }
0x1578   :  { %v1029_v39 = vmul.f32 %v1970_v43, %v1028_v37  ;;  %v1217_v37 = vld [vmem:[#allocation3 + $0xc] sm:$0x3] }
0x157a   :  { %1087 = vrot.lane.b32.xlu0 %v940_v4, %s1815_s15  ;;  %v1030_v42 = vadd.f32 %v1976_v46, %v1029_v39  ;;  %v1223_v39 = vsel %vm255_vm4, %v1217_v37, %v1221_v36 }
0x157c   :  { %v1063_v45 = vadd.f32 %v1062_v44, %v1030_v42 }
0x157e   :  { %v1479_v47 = vmul.f32 -1.442695, %v1063_v45 }
0x1580   :  { %1657 = vpow2.f32 %v1479_v47 }
0x158a   :  { %v1658_v48 = vpop.eup %1657 }
0x158b   :  { %v1067_v49 = vadd.f32 1.0, %v1658_v48 }
0x158d   :  { %1659 = vrcp.f32 %v1067_v49 }
0x1597   :  { %v1660_v50 = vpop.eup %1659 }
0x1598   :  { %v1081_v57 = vsub.f32 1.0, %v1660_v50 }
0x15e8   :  { %v1072_v51 = vpop.permute.xlu0 %1071 }
0x15e9   :  { %v1074_v52 = vmul.f32 %v1660_v50, %v1072_v51 }
0x15eb   :  { %1076 = vrot.lane.b32.xlu1 %v1074_v52, %s1806_s21 }
0x15ec   :  { %v1088_v56 = vpop.permute.xlu0 %1087 }
0x15ed   :  { %v1090_v59 = vmul.f32 %v1660_v50, %v1088_v56 }
0x165d   :  { %v1077_v53 = vpop.permute.xlu1 %1076 }
0x165e   :  { %v1079_v54 = vadd.f32 %v1077_v53, %v1062_v44 }
0x1660   :  { %1661 = vtanh.f32 %v1079_v54 }
0x166a   :  { %v1662_v55 = vpop.eup %1661 }
0x166b   :  { %1083 = vrot.lane.b32.xlu1 %v1662_v55, %s1816_s16 }
0x16dd   :  { %v1084_v58 = vpop.permute.xlu1 %1083 }
0x16de   :  { %v1086_v60 = vmul.f32 %v1084_v58, %v1081_v57 }
0x16e0   :  { %v1091_v61 = vadd.f32 %v1090_v59, %v1086_v60  ;;  %v1683_v59 = vld [vmem:[%s2211_s3] ss:$0 sm:$0xff] }
0x16e2   :  { %1093 = vrot.lane.b32.xlu1 %v1091_v61, %s1816_s16 }
0x1754   :  { %v1094_v62 = vpop.permute.xlu1 %1093 }
0x1755   :  { %1096 = vst.msk [vmem:[#allocation2] sm:$0xf] %vm86_vm0, %v1094_v62 }
0x1756   :  { %1098 = vst.msk [vmem:[#allocation9 + $0xa] sm:$0x3] %vm291_vm5, %v1094_v62 }
0x1757   :  { %1100 = vst.msk [vmem:[#allocation10 + $0x2] sm:$0xc] %vm294_vm6, %v1094_v62 }
0x175c   :  { %v2119_v63 = vld [vmem:[#allocation2] sm:$0xf] }
0x175d   :  { %1555 = vmatmul.mubr.msk.f32.vlgmr.msra.gmra.mrb[6].mxu0 %vm102_vm2, %v2119_v63 }
0x1830   :  { %v1171_v2 = vpop.f32.mrb[6].mxu0 }
0x1831   :  { %v1172_v3 = vadd.f32 %v1947_v7, %v1171_v2  ;;  %v1556_v4 = vpop.f32.mrb[7].mxu0 }
0x1833   :  { %1193 = vrot.lane.b32.xlu0 %v1172_v3, %s1814_s30  ;;  %v1179_v8 = vmul.f32 %v1172_v3, %v1172_v3  ;;  %v1175_v12 = vsel %vm176_vm3, %v1172_v3, 0.0 }
0x1835   :  { %1201 = vrot.lane.b32.xlu1 %v1179_v8, %s1814_s30  ;;  %v1180_v13 = vsel %vm176_vm3, %v1179_v8, 0.0 }
0x18a5   :  { %v1194_v9 = vpop.permute.xlu0 %1193 }
0x18a6   :  { %v1196_v6 = vsel %vm86_vm0, %v1194_v9, 0.0 }
0x18a7   :  { %1197 = vadd.xlane.f32.xlu0 %v1196_v6  ;;  %v1202_v10 = vpop.permute.xlu1 %1201 }
0x18a8   :  { %v1204_v11 = vsel %vm86_vm0, %v1202_v10, 0.0 }
0x18a9   :  { %1205 = vadd.xlane.f32.xlu1 %v1204_v11 }
0x18ab   :  { %1176 = vadd.xlane.f32.xlu0 %v1175_v12 }
0x18af   :  { %1181 = vadd.xlane.f32.xlu0 %v1180_v13 }
0x1934   :  { %v1198_v7 = vpop.xlane.xlu0 %1197 }
0x1935   :  { %v1199_v14 = vmul.f32 0.0625, %v1198_v7 }
0x1936   :  { %v1206_v5 = vpop.xlane.xlu1 %1205 }
0x1937   :  { %v1208_v1 = vmul.f32 %v1199_v14, %v1199_v14  ;;  %v1207_v15 = vmul.f32 0.0625, %v1206_v5  ;;  %v1210_v0 = vsub.f32 %v1172_v3, %v1199_v14 }
0x1938   :  { %v1177_v23 = vpop.xlane.xlu0 %1176 }
0x1939   :  { %v1209_v16 = vsub.f32 %v1207_v15, %v1208_v1  ;;  %v1178_v25 = vmul.f32 0.03125, %v1177_v23 }
0x193b   :  { %v1211_v17 = vadd.f32 1e-05, %v1209_v16  ;;  %v1184_v27 = vmul.f32 %v1178_v25, %v1178_v25  ;;  %v1186_v32 = vsub.f32 %v1172_v3, %v1178_v25 }
0x193c   :  { %v1182_v24 = vpop.xlane.xlu0 %1181 }
0x193d   :  { %1663 = vrsqrt.f32 %v1211_v17  ;;  %v1183_v26 = vmul.f32 0.03125, %v1182_v24 }
0x193f   :  { %v1185_v28 = vsub.f32 %v1183_v26, %v1184_v27 }
0x1941   :  { %v1187_v29 = vadd.f32 1e-05, %v1185_v28  ;;  %v1379_v28 = vld [vmem:[#allocation6] sm:$0x3] }
0x1943   :  { %1665 = vrsqrt.f32 %v1187_v29 }
0x1947   :  { %v1664_v18 = vpop.eup %1663 }
0x1948   :  { %v1213_v20 = vmul.f32 %v1664_v18, %v1210_v0 }
0x194a   :  { %v1214_v21 = vmul.f32 %v1213_v20, %v1960_v19 }
0x194c   :  { %v1215_v22 = vadd.f32 %v1214_v21, %v1962_v31 }
0x194d   :  { %v1666_v30 = vpop.eup %1665 }
0x194e   :  { %1232 = vrot.lane.b32.xlu1 %v1215_v22, %s1814_s30  ;;  %v1189_v33 = vmul.f32 %v1666_v30, %v1186_v32  ;;  %v1378_v30 = vld [vmem:[#allocation3 + $0xe] sm:$0x3]  ;;  %v1685_v32 = vld [vmem:[%s2213_s5] ss:$0 sm:$0xff] }
0x1950   :  { %v1190_v35 = vmul.f32 %v1970_v43, %v1189_v33 }
0x1952   :  { %v1191_v38 = vadd.f32 %v1976_v46, %v1190_v35 }
0x1954   :  { %v1224_v40 = vadd.f32 %v1223_v39, %v1191_v38 }
0x1956   :  { %v1481_v41 = vmul.f32 -1.442695, %v1224_v40 }
0x1958   :  { %1667 = vpow2.f32 %v1481_v41 }
0x1962   :  { %v1668_v42 = vpop.eup %1667 }
0x1963   :  { %v1228_v44 = vadd.f32 1.0, %v1668_v42 }
0x1965   :  { %1669 = vrcp.f32 %v1228_v44 }
0x196f   :  { %v1670_v45 = vpop.eup %1669 }
0x1970   :  { %v1242_v51 = vsub.f32 1.0, %v1670_v45 }
0x19c0   :  { %v1233_v47 = vpop.permute.xlu1 %1232 }
0x19c1   :  { %v1235_v48 = vmul.f32 %v1670_v45, %v1233_v47 }
0x19c3   :  { %1237 = vrot.lane.b32.xlu0 %v1235_v48, %s1806_s21 }
0x1a35   :  { %v1238_v49 = vpop.permute.xlu0 %1237 }
0x1a36   :  { %v1240_v50 = vadd.f32 %v1238_v49, %v1223_v39 }
0x1a38   :  { %1671 = vtanh.f32 %v1240_v50 }
0x1a42   :  { %v1672_v43 = vpop.eup %1671 }
0x1a43   :  { %1244 = vrot.lane.b32.xlu1 %v1672_v43, %s1816_s16 }
0x1a47   :  { %1248 = vrot.lane.b32.xlu1 %v2119_v63, %s1815_s15 }
0x1ab5   :  { %v1245_v46 = vpop.permute.xlu1 %1244 }
0x1ab6   :  { %v1247_v53 = vmul.f32 %v1245_v46, %v1242_v51 }
0x1ab9   :  { %v1249_v52 = vpop.permute.xlu1 %1248 }
0x1aba   :  { %v1251_v54 = vmul.f32 %v1670_v45, %v1249_v52 }
0x1abc   :  { %v1252_v55 = vadd.f32 %v1251_v54, %v1247_v53 }
0x1abe   :  { %1254 = vrot.lane.b32.xlu0 %v1252_v55, %s1816_s16 }
0x1b30   :  { %v1255_v56 = vpop.permute.xlu0 %1254 }
0x1b31   :  { %1257 = vst.msk [vmem:[#allocation2] sm:$0xf] %vm86_vm0, %v1255_v56 }
0x1b32   :  { %1259 = vst.msk [vmem:[#allocation9 + $0xc] sm:$0x3] %vm291_vm5, %v1255_v56 }
0x1b33   :  { %1261 = vst.msk [vmem:[#allocation10] sm:$0xc] %vm294_vm6, %v1255_v56 }
0x1b38   :  { %v1262_v57 = vld [vmem:[#allocation2] sm:$0xf] }
0x1b39   :  { %1562 = vmatmul.mubr.msk.f32.vlgmr.msra.gmra.mrb[6].mxu1 %vm102_vm2, %v1262_v57 }
0x1c0c   :  { %v1332_v58 = vpop.f32.mrb[6].mxu1 }
0x1c0d   :  { %v1333_v60 = vadd.f32 %v1683_v59, %v1332_v58  ;;  %v1563_v61 = vpop.f32.mrb[7].mxu1 }
0x1c0f   :  { %1354 = vrot.lane.b32.xlu1 %v1333_v60, %s1814_s30  ;;  %v1340_v62 = vmul.f32 %v1333_v60, %v1333_v60  ;;  %v1336_v2 = vsel %vm176_vm3, %v1333_v60, 0.0 }
0x1c11   :  { %1362 = vrot.lane.b32.xlu0 %v1340_v62, %s1814_s30  ;;  %v1341_v63 = vsel %vm176_vm3, %v1340_v62, 0.0 }
0x1c30   :  { %1342 = vadd.xlane.f32.xlu0 %v1341_v63 }
0x1c33   :  { %1337 = vadd.xlane.f32.xlu1 %v1336_v2 }
0x1c81   :  { %v1355_v3 = vpop.permute.xlu1 %1354 }
0x1c82   :  { %v1357_v4 = vsel %vm86_vm0, %v1355_v3, 0.0 }
0x1c83   :  { %v1363_v8 = vpop.permute.xlu0 %1362  ;;  %1358 = vadd.xlane.f32.xlu0 %v1357_v4 }
0x1c84   :  { %v1365_v9 = vsel %vm86_vm0, %v1363_v8, 0.0 }
0x1c85   :  { %1366 = vadd.xlane.f32.xlu1 %v1365_v9 }
0x1cbd   :  { %v1343_v6 = vpop.xlane.xlu0 %1342 }
0x1cbe   :  { %v1344_v22 = vmul.f32 0.03125, %v1343_v6 }
0x1cc0   :  { %v1338_v10 = vpop.xlane.xlu1 %1337 }
0x1cc1   :  { %v1339_v20 = vmul.f32 0.03125, %v1338_v10 }
0x1cc3   :  { %v1345_v21 = vmul.f32 %v1339_v20, %v1339_v20  ;;  %v1347_v26 = vsub.f32 %v1333_v60, %v1339_v20 }
0x1cc5   :  { %v1346_v23 = vsub.f32 %v1344_v22, %v1345_v21 }
0x1cc7   :  { %v1348_v24 = vadd.f32 1e-05, %v1346_v23 }
0x1d10   :  { %v1359_v11 = vpop.xlane.xlu0 %1358 }
0x1d11   :  { %v1360_v12 = vmul.f32 0.0625, %v1359_v11 }
0x1d12   :  { %v1367_v13 = vpop.xlane.xlu1 %1366 }
0x1d13   :  { %v1369_v7 = vmul.f32 %v1360_v12, %v1360_v12  ;;  %v1368_v14 = vmul.f32 0.0625, %v1367_v13  ;;  %v1371_v15 = vsub.f32 %v1333_v60, %v1360_v12 }
0x1d15   :  { %v1370_v5 = vsub.f32 %v1368_v14, %v1369_v7 }
0x1d17   :  { %v1372_v1 = vadd.f32 1e-05, %v1370_v5 }
0x1d19   :  { %1673 = vrsqrt.f32 %v1372_v1 }
0x1d1a   :  { %1675 = vrsqrt.f32 %v1348_v24 }
0x1d23   :  { %v1674_v16 = vpop.eup %1673 }
0x1d24   :  { %v1374_v17 = vmul.f32 %v1674_v16, %v1371_v15  ;;  %v1676_v25 = vpop.eup %1675 }
0x1d25   :  { %v1350_v27 = vmul.f32 %v1676_v25, %v1347_v26 }
0x1d26   :  { %v1375_v0 = vmul.f32 %v1374_v17, %v1960_v19  ;;  %v1684_v19 = vld [vmem:[%s2212_s4] ss:$0 sm:$0xff]  ;;  %s1817_s4 = smov [#allocation9]  }
0x1d27   :  { %v1351_v29 = vmul.f32 %v1684_v19, %v1350_v27  ;;  %s1426_s5 = sshll.u32 %s1817_s4, 4  ;;  %s1427_s5 = int_to_ptr.vmem [resolvable:$true] %s1426_s5 }
0x1d28   :  { %v1376_v18 = vadd.f32 %v1375_v0, %v1962_v31  ;;  %v1381_v31 = vrot.slane %v1379_v28, 6  ;;  %s1752_s0 = scalar_lea.vmem %s1427_s5, 256  ;;  %p1757_p11 = scmp.lt.s32.totalorder %s1427_s5, %s1427_s5 }
0x1d29   :  { %v1352_v33 = vadd.f32 %v1685_v32, %v1351_v29  ;;  %p1753_p10 = scmp.ne.s32.totalorder %s1427_s5, %s1752_s0  ;;  %p1758_p12 = scmp.lt.s32.totalorder %s1752_s0, %s1752_s0 }
0x1d2a   :  { %1392 = vrot.lane.b32.xlu0 %v1376_v18, %s1814_s30  ;;  %v1383_v34 = vsel %vm255_vm4, %v1378_v30, %v1381_v31 }
0x1d2b   :  { %v1384_v35 = vadd.f32 %v1383_v34, %v1352_v33  ;;  %p1759_p13 = por %p1758_p12, %p1757_p11 }
0x1d2d   :  { %v1483_v36 = vmul.f32 -1.442695, %v1384_v35  ;;  %p1760_p0 = pnand %p1759_p13, %p1753_p10 }
0x1d2e   :  { %1408 = vrot.lane.b32.xlu0 %v1262_v57, %s1815_s15 }
0x1d2f   :  { %1677 = vpow2.f32 %v1483_v36 }
0x1d39   :  { %v1678_v37 = vpop.eup %1677 }
0x1d3a   :  { %v1388_v38 = vadd.f32 1.0, %v1678_v37 }
0x1d3c   :  { %1679 = vrcp.f32 %v1388_v38 }
0x1d46   :  { %v1680_v39 = vpop.eup %1679 }
0x1d47   :  { %v1402_v48 = vsub.f32 1.0, %v1680_v39 }
0x1d9c   :  { %v1393_v40 = vpop.permute.xlu0 %1392 }
0x1d9d   :  { %v1395_v41 = vmul.f32 %v1680_v39, %v1393_v40 }
0x1d9f   :  { %1397 = vrot.lane.b32.xlu1 %v1395_v41, %s1806_s21 }
0x1da0   :  { %v1409_v47 = vpop.permute.xlu0 %1408 }
0x1da1   :  { %v1411_v50 = vmul.f32 %v1680_v39, %v1409_v47 }
0x1e11   :  { %v1398_v42 = vpop.permute.xlu1 %1397 }
0x1e12   :  { %v1400_v44 = vadd.f32 %v1398_v42, %v1383_v34 }
0x1e14   :  { %1681 = vtanh.f32 %v1400_v44 }
0x1e1e   :  { %v1682_v45 = vpop.eup %1681 }
0x1e1f   :  { %1404 = vrot.lane.b32.xlu1 %v1682_v45, %s1816_s16 }
0x1e91   :  { %v1405_v49 = vpop.permute.xlu1 %1404 }
0x1e92   :  { %v1407_v43 = vmul.f32 %v1405_v49, %v1402_v48 }
0x1e94   :  { %v1412_v46 = vadd.f32 %v1411_v50, %v1407_v43 }
0x1e96   :  { %1414 = vrot.lane.b32.xlu1 %v1412_v46, %s1816_s16 }
0x1f08   :  { %v1415_v51 = vpop.permute.xlu1 %1414 }
0x1f09   :  { %1417 = vst.msk [vmem:[#allocation2] sm:$0xf] %vm86_vm0, %v1415_v51 }
0x1f0a   :  { %1419 = vst.msk [vmem:[#allocation9 + $0xe] sm:$0x3] %vm291_vm5, %v1415_v51 }
0x1f0b   :  { %1420 = vst.msk [vmem:[#allocation10 - $0x2] sm:$0xc] %vm294_vm6, %v1415_v51 }
0x1f0c   :  { %1763 = shalt.err (!%p1760_p0)
}
0x1f0d   :  { %s1764_s27 = scalar_lea.hbm %s2216_s8, 256 }
0x1f0e   :  { %p1765_p1 = scmp.ne.s32.totalorder %s2216_s8, %s1764_s27  ;;  %p1768_p2 = scmp.lt.u32.totalorder %s1764_s27, %s2216_s8 }
0x1f10   :  { %p1770_p3 = pnand %p1768_p2, %p1765_p1 }
0x1f12   :  { %1773 = shalt.err (!%p1770_p3)
}
0x1f13   :  { %1432 = dma.vmem_to_hbm [thread:$0]  %s1427_s5, 256, %s2216_s8, [#allocation5], %s1806_s21, %s1806_s21, %s1807_s22  }
0x1f14   :  { %s1774_s13 = scalar_lea.vmem %s2168_s25, 256  ;;  %p1779_p5 = scmp.lt.s32.totalorder %s2168_s25, %s2168_s25 }
0x1f15   :  { %p1775_p4 = scmp.ne.s32.totalorder %s2168_s25, %s1774_s13  ;;  %p1780_p6 = scmp.lt.s32.totalorder %s1774_s13, %s1774_s13 }
0x1f17   :  { %p1781_p7 = por %p1780_p6, %p1779_p5 }
0x1f19   :  { %p1782_p8 = pnand %p1781_p7, %p1775_p4 }
0x1f1b   :  { %1785 = shalt.err (!%p1782_p8)
}
0x1f1c   :  { %s1786_s10 = scalar_lea.hbm %s2217_s9, 256 }
0x1f1d   :  { %p1787_p9 = scmp.ne.s32.totalorder %s2217_s9, %s1786_s10  ;;  %p1790_p10 = scmp.lt.u32.totalorder %s1786_s10, %s2217_s9 }
0x1f1f   :  { %p1792_p11 = pnand %p1790_p10, %p1787_p9 }
0x1f21   :  { %1795 = shalt.err (!%p1792_p11)
}
0x1f22   :  { %1448 = dma.vmem_to_hbm [thread:$0]  %s2168_s25, 256, %s2217_s9, [#allocation11], %s1806_s21, %s1806_s21, %s1807_s22  }
0x1f23   :  { %1800 = dma.done.wait [#allocation5], 256  }
0x1f24   :  { %1801 = vsyncadd [#allocation5], 4294967040 }
0x1f25   :  { %1802 = dma.done.wait [#allocation11], 256  }
0x1f26   :  { %1803 = vsyncadd [#allocation11], 4294967040 }
0x1f27   :  { %1455 = vsyncpa [#allocation4], 1 }
0x1f28   :  { %1456 = vsyncpa [#allocation7], 1 }
0x1f29   :  { %1457 = vsyncpa [#allocation5], 1 }
0x1f2a   :  { %1458 = vsyncpa [#allocation11], 1 }

</bundles_post_ra>
